<compile_context>
chip_gen: v5e
topology: v5e:2x2
jax: 0.10.0
libtpu: 0.0.40
codegen_flags: <defaults>
</compile_context>

<pallas_src>
import math

import jax
import jax.numpy as jnp
from jax.experimental import pallas as pl
from jax.experimental.pallas import tpu as pltpu


# ----------------------------- config (small) --------------------------------
VOCAB = 64          # vocab size after "resize_token_embeddings"
HIDDEN = 32         # bert.config.hidden_size
N_HEADS = 2
HEAD_DIM = HIDDEN // N_HEADS
INTERMEDIATE = 64
N_LAYERS = 2
MAX_POS = 16
TYPE_VOCAB = 2
N_CLASSES = 2
HIDDEN2 = HIDDEN // 2
BERT_LN_EPS = 1e-12
HEAD_LN_EPS = 1e-5          # nn.LayerNorm default
LANE = 128                  # lane-dense output padding
_INV_SQRT2 = 1.0 / math.sqrt(2.0)
_ATTN_SCALE = 1.0 / math.sqrt(HEAD_DIM)


# ----------------------------- fused Pallas kernel ----------------------------
def _layer_norm(x, g, b, eps):
    mu = jnp.mean(x, axis=-1, keepdims=True)
    var = jnp.mean((x - mu) ** 2, axis=-1, keepdims=True)
    return (x - mu) * jax.lax.rsqrt(var + eps) * g + b


def _fused_forward_kernel(
    x_ref, mask_ref,
    eg_ref, eb_ref,
    qkvw_ref, qkvb_ref, aow_ref, aob_ref, alg_ref, alb_ref,
    f1w_ref, f1b_ref, f2w_ref, f2b_ref, flg_ref, flb_ref,
    pw_ref, pb_ref,
    c1w_ref, c1b_ref, hg_ref, hb_ref, ow_ref, ob_ref,
    o_ref,
):
    # One grid step == one batch element. x_ref: [S, H] summed embeddings.
    S = x_ref.shape[0]

    # ---- embedding LayerNorm ----
    h = _layer_norm(x_ref[...], eg_ref[...], eb_ref[...], BERT_LN_EPS)      # [S, H]

    # additive key mask: 0 for valid tokens, -10000 for padding (HF semantics)
    add_mask = (1.0 - mask_ref[0]) * -10000.0                               # [1, S]

    # ---- transformer layers (unrolled; all weights VMEM-resident) ----
    for l in range(N_LAYERS):
        # fused QKV projection: [S, H] @ [H, 3H]
        qkv = jnp.dot(h, qkvw_ref[l],
                      preferred_element_type=jnp.float32) + qkvb_ref[l]     # [S, 3H]

        heads = []
        for hd in range(N_HEADS):
            q = qkv[:, hd * HEAD_DIM:(hd + 1) * HEAD_DIM]
            k = qkv[:, HIDDEN + hd * HEAD_DIM:HIDDEN + (hd + 1) * HEAD_DIM]
            v = qkv[:, 2 * HIDDEN + hd * HEAD_DIM:2 * HIDDEN + (hd + 1) * HEAD_DIM]
            s = jnp.dot(q, k.T, preferred_element_type=jnp.float32) * _ATTN_SCALE
            s = s + add_mask                                                # [S, S]
            m = jnp.max(s, axis=-1, keepdims=True)
            p = jnp.exp(s - m)
            p = p * pl.reciprocal(jnp.sum(p, axis=-1, keepdims=True), approx=True)
            heads.append(jnp.dot(p, v, preferred_element_type=jnp.float32))  # [S, dh]
        ctx = jnp.concatenate(heads, axis=-1)                                # [S, H]

        attn = jnp.dot(ctx, aow_ref[l],
                       preferred_element_type=jnp.float32) + aob_ref[l]
        h = _layer_norm(attn + h, alg_ref[l], alb_ref[l], BERT_LN_EPS)

        ff = jnp.dot(h, f1w_ref[l],
                     preferred_element_type=jnp.float32) + f1b_ref[l]
        ff = 0.5 * ff * (1.0 + jax.lax.erf(ff * _INV_SQRT2))                 # exact GELU
        ff = jnp.dot(ff, f2w_ref[l],
                     preferred_element_type=jnp.float32) + f2b_ref[l]
        h = _layer_norm(ff + h, flg_ref[l], flb_ref[l], BERT_LN_EPS)

    # ---- pooler: tanh(W h + b). Computed on all S rows (MXU min tile anyway);
    #      only row 0 ([CLS]) is consumed by the wrapper. ----
    pooled = jnp.tanh(jnp.dot(h, pw_ref[...],
                              preferred_element_type=jnp.float32) + pb_ref[...])

    # ---- classifier head: drop1(id) -> fc1 -> relu -> drop2(id) -> LN -> out ----
    fc = jnp.dot(pooled, c1w_ref[...],
                 preferred_element_type=jnp.float32) + c1b_ref[...]
    fc = jnp.maximum(fc, 0.0)
    fc = _layer_norm(fc, hg_ref[...], hb_ref[...], HEAD_LN_EPS)
    # out_w / out_b are zero-padded to 128 lanes -> full, unmasked vector stores.
    logits = jnp.dot(fc, ow_ref[...],
                     preferred_element_type=jnp.float32) + ob_ref[...]       # [S, LANE]

    o_ref[...] = logits[None].astype(o_ref.dtype)                            # [1, S, LANE]


# ----------------------------- parameter init ---------------------------------
def init_params(key):
    std = 0.02
    ks = iter(jax.random.split(key, 16))
    nrm = lambda shape: (std * jax.random.normal(next(ks), shape)).astype(jnp.float32)
    zeros = lambda shape: jnp.zeros(shape, jnp.float32)
    ones = lambda shape: jnp.ones(shape, jnp.float32)
    H, H2, I, L = HIDDEN, HIDDEN2, INTERMEDIATE, N_LAYERS
    return {
        # embeddings
        "word_emb": nrm((VOCAB, H)),
        "pos_emb": nrm((MAX_POS, H)),
        "type_emb": nrm((TYPE_VOCAB, H)),
        "emb_ln_g": ones((1, H)), "emb_ln_b": zeros((1, H)),
        # per-layer weights stacked on a leading N_LAYERS axis (VMEM-resident)
        "qkv_w": nrm((L, H, 3 * H)), "qkv_b": zeros((L, 1, 3 * H)),
        "ao_w": nrm((L, H, H)), "ao_b": zeros((L, 1, H)),
        "a_ln_g": ones((L, 1, H)), "a_ln_b": zeros((L, 1, H)),
        "ff1_w": nrm((L, H, I)), "ff1_b": zeros((L, 1, I)),
        "ff2_w": nrm((L, I, H)), "ff2_b": zeros((L, 1, H)),
        "f_ln_g": ones((L, 1, H)), "f_ln_b": zeros((L, 1, H)),
        # pooler
        "pool_w": nrm((H, H)), "pool_b": zeros((1, H)),
        # classifier head (out_w/out_b lane-padded to 128 cols, zeros beyond N_CLASSES)
        "fc1_w": nrm((H, H2)), "fc1_b": zeros((1, H2)),
        "hln_g": ones((1, H2)), "hln_b": zeros((1, H2)),
        "out_w": jnp.pad(nrm((H2, N_CLASSES)), ((0, 0), (0, LANE - N_CLASSES))),
        "out_b": zeros((1, LANE)),
    }


_WEIGHT_NAMES = [
    "emb_ln_g", "emb_ln_b",
    "qkv_w", "qkv_b", "ao_w", "ao_b", "a_ln_g", "a_ln_b",
    "ff1_w", "ff1_b", "ff2_w", "ff2_b", "f_ln_g", "f_ln_b",
    "pool_w", "pool_b",
    "fc1_w", "fc1_b", "hln_g", "hln_b", "out_w", "out_b",
]


def _rep_spec(shape):
    """Full-array block, same (weight) block for every grid step."""
    nd = len(shape)

    def idx(b):
        return (0,) * nd

    return pl.BlockSpec(shape, idx)


# ----------------------------- forward pass ------------------------------------
def sentiment_classifier_forward(params, input_ids, attention_mask):
    B, S = input_ids.shape

    # ---- embedding gather + sum (XLA glue; everything else is one Pallas call) ----
    word = params["word_emb"][input_ids]                    # [B, S, H]
    pos = params["pos_emb"][:S][None]                       # [1, S, H]
    typ = params["type_emb"][0][None, None]                 # [1, 1, H] (token_type_ids=0)
    x = (word + pos + typ).astype(jnp.float32).reshape(B * S, HIDDEN)
    mask = attention_mask.astype(jnp.float32).reshape(B, 1, S)

    weights = [params[n] for n in _WEIGHT_NAMES]

    in_specs = (
        [pl.BlockSpec((S, HIDDEN), lambda b: (b, 0)),       # rows of batch b
         pl.BlockSpec((1, 1, S), lambda b: (b, 0, 0))]      # mask of batch b
        + [_rep_spec(w.shape) for w in weights]
    )

    out = pl.pallas_call(
        _fused_forward_kernel,
        out_shape=jax.ShapeDtypeStruct((B, S, LANE), jnp.float32),
        grid=(B,),
        in_specs=in_specs,
        out_specs=pl.BlockSpec((1, S, LANE), lambda b: (b, 0, 0)),
        compiler_params=pltpu.CompilerParams(
            dimension_semantics=("parallel",)),              # 2 TCs on v7x
    )(x, mask, *weights)

    # [CLS] row (seq position 0), valid class columns.
    return out[:, 0, :N_CLASSES]


# ----------------------------- pure-JAX reference ------------------------------
def _reference_forward(params, input_ids, attention_mask):
    B, S = input_ids.shape
    word = params["word_emb"][input_ids]
    pos = params["pos_emb"][:S][None]
    typ = params["type_emb"][0][None, None]
    x = (word + pos + typ).astype(jnp.float32)               # [B, S, H]

    def ln(t, g, b, eps):
        mu = t.mean(-1, keepdims=True)
        var = ((t - mu) ** 2).mean(-1, keepdims=True)
        return (t - mu) / jnp.sqrt(var + eps) * g + b

    h = ln(x, params["emb_ln_g"], params["emb_ln_b"], BERT_LN_EPS)
    add_mask = (1.0 - attention_mask.astype(jnp.float32)) * -10000.0   # [B, S]

    for l in range(N_LAYERS):
        qkv = h @ params["qkv_w"][l] + params["qkv_b"][l]
        q, k, v = jnp.split(qkv, 3, axis=-1)

        def sh(t):
            return t.reshape(B, S, N_HEADS, HEAD_DIM).transpose(0, 2, 1, 3)

        q, k, v = sh(q), sh(k), sh(v)
        s = jnp.einsum("bhqd,bhkd->bhqk", q, k) * _ATTN_SCALE
        s = s + add_mask[:, None, None, :]
        p = jax.nn.softmax(s, axis=-1)
        ctx = jnp.einsum("bhqk,bhkd->bhqd", p, v).transpose(0, 2, 1, 3).reshape(B, S, HIDDEN)
        attn = ctx @ params["ao_w"][l] + params["ao_b"][l]
        h = ln(attn + h, params["a_ln_g"][l], params["a_ln_b"][l], BERT_LN_EPS)
        ff = h @ params["ff1_w"][l] + params["ff1_b"][l]
        ff = 0.5 * ff * (1.0 + jax.lax.erf(ff * _INV_SQRT2))
        ff = ff @ params["ff2_w"][l] + params["ff2_b"][l]
        h = ln(ff + h, params["f_ln_g"][l], params["f_ln_b"][l], BERT_LN_EPS)

    pooled = jnp.tanh(h[:, 0] @ params["pool_w"] + params["pool_b"])
    fc = jnp.maximum(pooled @ params["fc1_w"] + params["fc1_b"], 0.0)
    fc = ln(fc, params["hln_g"], params["hln_b"], HEAD_LN_EPS)
    return fc @ params["out_w"][:, :N_CLASSES] + params["out_b"][:, :N_CLASSES]


# ----------------------------------- main ---------------------------------------
if __name__ == "__main__":
    key = jax.random.PRNGKey(0)
    k_param, k_ids = jax.random.split(key)

    params = init_params(k_param)

    B, S = 2, 8
    input_ids = jax.random.randint(k_ids, (B, S), 0, VOCAB, dtype=jnp.int32)
    attention_mask = jnp.array(
        [[1, 1, 1, 1, 1, 1, 1, 1],
         [1, 1, 1, 1, 1, 0, 0, 0]], dtype=jnp.int32)

    logits = jax.jit(sentiment_classifier_forward)(params, input_ids, attention_mask)
    logits = jax.block_until_ready(logits)

    ref = _reference_forward(params, input_ids, attention_mask)

    assert logits.shape == (B, N_CLASSES)
    assert bool(jnp.all(jnp.isfinite(logits)))
    assert bool(jnp.allclose(logits, ref, atol=5e-3, rtol=5e-3)), (logits, ref)
    print("KERNEL_OK")
</pallas_src>

<mosaic_0001>
module attributes {stable_mosaic.version = 11 : i64} {
  func.func @_fused_forward_kernel(%arg0: i32, %arg1: memref<8x32xf32, #tpu.memory_space<vmem>>, %arg2: memref<1x1x8xf32, #tpu.memory_space<vmem>>, %arg3: memref<1x32xf32, #tpu.memory_space<vmem>>, %arg4: memref<1x32xf32, #tpu.memory_space<vmem>>, %arg5: memref<2x32x96xf32, #tpu.memory_space<vmem>>, %arg6: memref<2x1x96xf32, #tpu.memory_space<vmem>>, %arg7: memref<2x32x32xf32, #tpu.memory_space<vmem>>, %arg8: memref<2x1x32xf32, #tpu.memory_space<vmem>>, %arg9: memref<2x1x32xf32, #tpu.memory_space<vmem>>, %arg10: memref<2x1x32xf32, #tpu.memory_space<vmem>>, %arg11: memref<2x32x64xf32, #tpu.memory_space<vmem>>, %arg12: memref<2x1x64xf32, #tpu.memory_space<vmem>>, %arg13: memref<2x64x32xf32, #tpu.memory_space<vmem>>, %arg14: memref<2x1x32xf32, #tpu.memory_space<vmem>>, %arg15: memref<2x1x32xf32, #tpu.memory_space<vmem>>, %arg16: memref<2x1x32xf32, #tpu.memory_space<vmem>>, %arg17: memref<32x32xf32, #tpu.memory_space<vmem>>, %arg18: memref<1x32xf32, #tpu.memory_space<vmem>>, %arg19: memref<32x16xf32, #tpu.memory_space<vmem>>, %arg20: memref<1x16xf32, #tpu.memory_space<vmem>>, %arg21: memref<1x16xf32, #tpu.memory_space<vmem>>, %arg22: memref<1x16xf32, #tpu.memory_space<vmem>>, %arg23: memref<16x128xf32, #tpu.memory_space<vmem>>, %arg24: memref<1x128xf32, #tpu.memory_space<vmem>>, %arg25: memref<1x8x128xf32, #tpu.memory_space<vmem>>) attributes {dimension_semantics = [#tpu.dimension_semantics<parallel>], iteration_bounds = array<i64: 2>, scalar_prefetch = 0 : i64, scratch_operands = 0 : i64, tpu.core_type = #tpu.core_type<tc>, window_params = [{transform_indices = @transform_0, window_bounds = array<i64: 8, 32>}, {transform_indices = @transform_1, window_bounds = array<i64: 1, 1, 8>}, {pipeline_mode = #tpu.pipeline_mode<synchronous>, transform_indices = @transform_2, window_bounds = array<i64: 1, 32>}, {pipeline_mode = #tpu.pipeline_mode<synchronous>, transform_indices = @transform_3, window_bounds = array<i64: 1, 32>}, {pipeline_mode = #tpu.pipeline_mode<synchronous>, transform_indices = @transform_4, window_bounds = array<i64: 2, 32, 96>}, {pipeline_mode = #tpu.pipeline_mode<synchronous>, transform_indices = @transform_5, window_bounds = array<i64: 2, 1, 96>}, {pipeline_mode = #tpu.pipeline_mode<synchronous>, transform_indices = @transform_6, window_bounds = array<i64: 2, 32, 32>}, {pipeline_mode = #tpu.pipeline_mode<synchronous>, transform_indices = @transform_7, window_bounds = array<i64: 2, 1, 32>}, {pipeline_mode = #tpu.pipeline_mode<synchronous>, transform_indices = @transform_8, window_bounds = array<i64: 2, 1, 32>}, {pipeline_mode = #tpu.pipeline_mode<synchronous>, transform_indices = @transform_9, window_bounds = array<i64: 2, 1, 32>}, {pipeline_mode = #tpu.pipeline_mode<synchronous>, transform_indices = @transform_10, window_bounds = array<i64: 2, 32, 64>}, {pipeline_mode = #tpu.pipeline_mode<synchronous>, transform_indices = @transform_11, window_bounds = array<i64: 2, 1, 64>}, {pipeline_mode = #tpu.pipeline_mode<synchronous>, transform_indices = @transform_12, window_bounds = array<i64: 2, 64, 32>}, {pipeline_mode = #tpu.pipeline_mode<synchronous>, transform_indices = @transform_13, window_bounds = array<i64: 2, 1, 32>}, {pipeline_mode = #tpu.pipeline_mode<synchronous>, transform_indices = @transform_14, window_bounds = array<i64: 2, 1, 32>}, {pipeline_mode = #tpu.pipeline_mode<synchronous>, transform_indices = @transform_15, window_bounds = array<i64: 2, 1, 32>}, {pipeline_mode = #tpu.pipeline_mode<synchronous>, transform_indices = @transform_16, window_bounds = array<i64: 32, 32>}, {pipeline_mode = #tpu.pipeline_mode<synchronous>, transform_indices = @transform_17, window_bounds = array<i64: 1, 32>}, {pipeline_mode = #tpu.pipeline_mode<synchronous>, transform_indices = @transform_18, window_bounds = array<i64: 32, 16>}, {pipeline_mode = #tpu.pipeline_mode<synchronous>, transform_indices = @transform_19, window_bounds = array<i64: 1, 16>}, {pipeline_mode = #tpu.pipeline_mode<synchronous>, transform_indices = @transform_20, window_bounds = array<i64: 1, 16>}, {pipeline_mode = #tpu.pipeline_mode<synchronous>, transform_indices = @transform_21, window_bounds = array<i64: 1, 16>}, {pipeline_mode = #tpu.pipeline_mode<synchronous>, transform_indices = @transform_22, window_bounds = array<i64: 16, 128>}, {pipeline_mode = #tpu.pipeline_mode<synchronous>, transform_indices = @transform_23, window_bounds = array<i64: 1, 128>}, {transform_indices = @transform_24, window_bounds = array<i64: 1, 8, 128>}]} {
    %c0 = arith.constant 0 : index
    %c0_0 = arith.constant 0 : index
    %0 = vector.load %arg1[%c0, %c0_0] : memref<8x32xf32, #tpu.memory_space<vmem>>, vector<8x32xf32>
    %c0_1 = arith.constant 0 : index
    %c0_2 = arith.constant 0 : index
    %1 = vector.load %arg3[%c0_1, %c0_2] : memref<1x32xf32, #tpu.memory_space<vmem>>, vector<1x32xf32>
    %c0_3 = arith.constant 0 : index
    %c0_4 = arith.constant 0 : index
    %2 = vector.load %arg4[%c0_3, %c0_4] : memref<1x32xf32, #tpu.memory_space<vmem>>, vector<1x32xf32>
    %cst = arith.constant dense<0.000000e+00> : vector<8xf32>
    %3 = vector.multi_reduction <add>, %0, %cst [1] : vector<8x32xf32> to vector<8xf32>
    %4 = vector.shape_cast %3 : vector<8xf32> to vector<8x1xf32>
    %cst_5 = arith.constant 3.200000e+01 : f32
    %5 = vector.broadcast %cst_5 : f32 to vector<8x1xf32>
    %6 = arith.divf %4, %5 : vector<8x1xf32>
    %7 = vector.broadcast %6 : vector<8x1xf32> to vector<8x32xf32>
    %8 = arith.subf %0, %7 : vector<8x32xf32>
    %9 = arith.mulf %8, %8 : vector<8x32xf32>
    %cst_6 = arith.constant dense<0.000000e+00> : vector<8xf32>
    %10 = vector.multi_reduction <add>, %9, %cst_6 [1] : vector<8x32xf32> to vector<8xf32>
    %11 = vector.shape_cast %10 : vector<8xf32> to vector<8x1xf32>
    %cst_7 = arith.constant 3.200000e+01 : f32
    %12 = vector.broadcast %cst_7 : f32 to vector<8x1xf32>
    %13 = arith.divf %11, %12 : vector<8x1xf32>
    %14 = vector.broadcast %6 : vector<8x1xf32> to vector<8x32xf32>
    %15 = arith.subf %0, %14 : vector<8x32xf32>
    %cst_8 = arith.constant 9.99999996E-13 : f32
    %16 = vector.broadcast %cst_8 : f32 to vector<8x1xf32>
    %17 = arith.addf %13, %16 : vector<8x1xf32>
    %18 = math.rsqrt %17 : vector<8x1xf32>
    %19 = vector.broadcast %18 : vector<8x1xf32> to vector<8x32xf32>
    %20 = arith.mulf %15, %19 : vector<8x32xf32>
    %21 = vector.broadcast %1 : vector<1x32xf32> to vector<8x32xf32>
    %22 = arith.mulf %20, %21 : vector<8x32xf32>
    %23 = vector.broadcast %2 : vector<1x32xf32> to vector<8x32xf32>
    %24 = arith.addf %22, %23 : vector<8x32xf32>
    %c0_9 = arith.constant 0 : index
    %c0_10 = arith.constant 0 : index
    %c0_11 = arith.constant 0 : index
    %25 = vector.load %arg2[%c0_9, %c0_10, %c0_11] : memref<1x1x8xf32, #tpu.memory_space<vmem>>, vector<1x1x8xf32>
    %26 = vector.shape_cast %25 : vector<1x1x8xf32> to vector<1x8xf32>
    %cst_12 = arith.constant 1.000000e+00 : f32
    %27 = vector.broadcast %cst_12 : f32 to vector<1x8xf32>
    %28 = arith.subf %27, %26 : vector<1x8xf32>
    %cst_13 = arith.constant -1.000000e+04 : f32
    %29 = vector.broadcast %cst_13 : f32 to vector<1x8xf32>
    %30 = arith.mulf %28, %29 : vector<1x8xf32>
    %c0_14 = arith.constant 0 : index
    %c0_15 = arith.constant 0 : index
    %c0_16 = arith.constant 0 : index
    %31 = vector.load %arg5[%c0_14, %c0_15, %c0_16] : memref<2x32x96xf32, #tpu.memory_space<vmem>>, vector<1x32x96xf32>
    %32 = vector.shape_cast %31 : vector<1x32x96xf32> to vector<32x96xf32>
    %cst_17 = arith.constant dense<0.000000e+00> : vector<8x96xf32>
    %33 = tpu.matmul %24, %32, %cst_17 {dimension_numbers = #tpu.dot_dimension_numbers<[1], [0], [0], [1], [0, 0, 1, 1], [], []>} : vector<8x32xf32>, vector<32x96xf32>, vector<8x96xf32> -> vector<8x96xf32>
    %c0_18 = arith.constant 0 : index
    %c0_19 = arith.constant 0 : index
    %c0_20 = arith.constant 0 : index
    %34 = vector.load %arg6[%c0_18, %c0_19, %c0_20] : memref<2x1x96xf32, #tpu.memory_space<vmem>>, vector<1x1x96xf32>
    %35 = vector.shape_cast %34 : vector<1x1x96xf32> to vector<1x96xf32>
    %36 = vector.broadcast %35 : vector<1x96xf32> to vector<8x96xf32>
    %37 = arith.addf %33, %36 : vector<8x96xf32>
    %38 = vector.extract_strided_slice %37 {offsets = [0, 0], sizes = [8, 16], strides = [1, 1]} : vector<8x96xf32> to vector<8x16xf32>
    %39 = vector.extract_strided_slice %37 {offsets = [0, 32], sizes = [8, 16], strides = [1, 1]} : vector<8x96xf32> to vector<8x16xf32>
    %40 = vector.extract_strided_slice %37 {offsets = [0, 64], sizes = [8, 16], strides = [1, 1]} : vector<8x96xf32> to vector<8x16xf32>
    %41 = tpu.transpose %39, [1, 0] : vector<8x16xf32> -> vector<16x8xf32>
    %cst_21 = arith.constant dense<0.000000e+00> : vector<8x8xf32>
    %42 = tpu.matmul %38, %41, %cst_21 {dimension_numbers = #tpu.dot_dimension_numbers<[1], [0], [0], [1], [0, 0, 1, 1], [], []>} : vector<8x16xf32>, vector<16x8xf32>, vector<8x8xf32> -> vector<8x8xf32>
    %cst_22 = arith.constant 2.500000e-01 : f32
    %43 = vector.broadcast %cst_22 : f32 to vector<8x8xf32>
    %44 = arith.mulf %42, %43 : vector<8x8xf32>
    %45 = vector.broadcast %30 : vector<1x8xf32> to vector<8x8xf32>
    %46 = arith.addf %44, %45 : vector<8x8xf32>
    %cst_23 = arith.constant dense<0xFF800000> : vector<8xf32>
    %47 = vector.multi_reduction <maximumf>, %46, %cst_23 [1] : vector<8x8xf32> to vector<8xf32>
    %48 = vector.shape_cast %47 : vector<8xf32> to vector<8x1xf32>
    %49 = vector.broadcast %48 : vector<8x1xf32> to vector<8x8xf32>
    %50 = arith.subf %46, %49 : vector<8x8xf32>
    %51 = math.exp %50 : vector<8x8xf32>
    %cst_24 = arith.constant dense<0.000000e+00> : vector<8xf32>
    %52 = vector.multi_reduction <add>, %51, %cst_24 [1] : vector<8x8xf32> to vector<8xf32>
    %53 = vector.shape_cast %52 : vector<8xf32> to vector<8x1xf32>
    %54 = tpu.reciprocal %53 {approx = true} : vector<8x1xf32> -> vector<8x1xf32>
    %55 = vector.broadcast %54 : vector<8x1xf32> to vector<8x8xf32>
    %56 = arith.mulf %51, %55 : vector<8x8xf32>
    %cst_25 = arith.constant dense<0.000000e+00> : vector<8x16xf32>
    %57 = tpu.matmul %56, %40, %cst_25 {dimension_numbers = #tpu.dot_dimension_numbers<[1], [0], [0], [1], [0, 0, 1, 1], [], []>} : vector<8x8xf32>, vector<8x16xf32>, vector<8x16xf32> -> vector<8x16xf32>
    %58 = vector.extract_strided_slice %37 {offsets = [0, 16], sizes = [8, 16], strides = [1, 1]} : vector<8x96xf32> to vector<8x16xf32>
    %59 = vector.extract_strided_slice %37 {offsets = [0, 48], sizes = [8, 16], strides = [1, 1]} : vector<8x96xf32> to vector<8x16xf32>
    %60 = vector.extract_strided_slice %37 {offsets = [0, 80], sizes = [8, 16], strides = [1, 1]} : vector<8x96xf32> to vector<8x16xf32>
    %61 = tpu.transpose %59, [1, 0] : vector<8x16xf32> -> vector<16x8xf32>
    %cst_26 = arith.constant dense<0.000000e+00> : vector<8x8xf32>
    %62 = tpu.matmul %58, %61, %cst_26 {dimension_numbers = #tpu.dot_dimension_numbers<[1], [0], [0], [1], [0, 0, 1, 1], [], []>} : vector<8x16xf32>, vector<16x8xf32>, vector<8x8xf32> -> vector<8x8xf32>
    %cst_27 = arith.constant 2.500000e-01 : f32
    %63 = vector.broadcast %cst_27 : f32 to vector<8x8xf32>
    %64 = arith.mulf %62, %63 : vector<8x8xf32>
    %65 = vector.broadcast %30 : vector<1x8xf32> to vector<8x8xf32>
    %66 = arith.addf %64, %65 : vector<8x8xf32>
    %cst_28 = arith.constant dense<0xFF800000> : vector<8xf32>
    %67 = vector.multi_reduction <maximumf>, %66, %cst_28 [1] : vector<8x8xf32> to vector<8xf32>
    %68 = vector.shape_cast %67 : vector<8xf32> to vector<8x1xf32>
    %69 = vector.broadcast %68 : vector<8x1xf32> to vector<8x8xf32>
    %70 = arith.subf %66, %69 : vector<8x8xf32>
    %71 = math.exp %70 : vector<8x8xf32>
    %cst_29 = arith.constant dense<0.000000e+00> : vector<8xf32>
    %72 = vector.multi_reduction <add>, %71, %cst_29 [1] : vector<8x8xf32> to vector<8xf32>
    %73 = vector.shape_cast %72 : vector<8xf32> to vector<8x1xf32>
    %74 = tpu.reciprocal %73 {approx = true} : vector<8x1xf32> -> vector<8x1xf32>
    %75 = vector.broadcast %74 : vector<8x1xf32> to vector<8x8xf32>
    %76 = arith.mulf %71, %75 : vector<8x8xf32>
    %cst_30 = arith.constant dense<0.000000e+00> : vector<8x16xf32>
    %77 = tpu.matmul %76, %60, %cst_30 {dimension_numbers = #tpu.dot_dimension_numbers<[1], [0], [0], [1], [0, 0, 1, 1], [], []>} : vector<8x8xf32>, vector<8x16xf32>, vector<8x16xf32> -> vector<8x16xf32>
    %78 = tpu.concatenate %57, %77 in 1 : vector<8x16xf32>, vector<8x16xf32> -> vector<8x32xf32>
    %c0_31 = arith.constant 0 : index
    %c0_32 = arith.constant 0 : index
    %c0_33 = arith.constant 0 : index
    %79 = vector.load %arg7[%c0_31, %c0_32, %c0_33] : memref<2x32x32xf32, #tpu.memory_space<vmem>>, vector<1x32x32xf32>
    %80 = vector.shape_cast %79 : vector<1x32x32xf32> to vector<32x32xf32>
    %cst_34 = arith.constant dense<0.000000e+00> : vector<8x32xf32>
    %81 = tpu.matmul %78, %80, %cst_34 {dimension_numbers = #tpu.dot_dimension_numbers<[1], [0], [0], [1], [0, 0, 1, 1], [], []>} : vector<8x32xf32>, vector<32x32xf32>, vector<8x32xf32> -> vector<8x32xf32>
    %c0_35 = arith.constant 0 : index
    %c0_36 = arith.constant 0 : index
    %c0_37 = arith.constant 0 : index
    %82 = vector.load %arg8[%c0_35, %c0_36, %c0_37] : memref<2x1x32xf32, #tpu.memory_space<vmem>>, vector<1x1x32xf32>
    %83 = vector.shape_cast %82 : vector<1x1x32xf32> to vector<1x32xf32>
    %84 = vector.broadcast %83 : vector<1x32xf32> to vector<8x32xf32>
    %85 = arith.addf %81, %84 : vector<8x32xf32>
    %86 = arith.addf %85, %24 : vector<8x32xf32>
    %c0_38 = arith.constant 0 : index
    %c0_39 = arith.constant 0 : index
    %c0_40 = arith.constant 0 : index
    %87 = vector.load %arg9[%c0_38, %c0_39, %c0_40] : memref<2x1x32xf32, #tpu.memory_space<vmem>>, vector<1x1x32xf32>
    %88 = vector.shape_cast %87 : vector<1x1x32xf32> to vector<1x32xf32>
    %c0_41 = arith.constant 0 : index
    %c0_42 = arith.constant 0 : index
    %c0_43 = arith.constant 0 : index
    %89 = vector.load %arg10[%c0_41, %c0_42, %c0_43] : memref<2x1x32xf32, #tpu.memory_space<vmem>>, vector<1x1x32xf32>
    %90 = vector.shape_cast %89 : vector<1x1x32xf32> to vector<1x32xf32>
    %cst_44 = arith.constant dense<0.000000e+00> : vector<8xf32>
    %91 = vector.multi_reduction <add>, %86, %cst_44 [1] : vector<8x32xf32> to vector<8xf32>
    %92 = vector.shape_cast %91 : vector<8xf32> to vector<8x1xf32>
    %cst_45 = arith.constant 3.200000e+01 : f32
    %93 = vector.broadcast %cst_45 : f32 to vector<8x1xf32>
    %94 = arith.divf %92, %93 : vector<8x1xf32>
    %95 = vector.broadcast %94 : vector<8x1xf32> to vector<8x32xf32>
    %96 = arith.subf %86, %95 : vector<8x32xf32>
    %97 = arith.mulf %96, %96 : vector<8x32xf32>
    %cst_46 = arith.constant dense<0.000000e+00> : vector<8xf32>
    %98 = vector.multi_reduction <add>, %97, %cst_46 [1] : vector<8x32xf32> to vector<8xf32>
    %99 = vector.shape_cast %98 : vector<8xf32> to vector<8x1xf32>
    %cst_47 = arith.constant 3.200000e+01 : f32
    %100 = vector.broadcast %cst_47 : f32 to vector<8x1xf32>
    %101 = arith.divf %99, %100 : vector<8x1xf32>
    %102 = vector.broadcast %94 : vector<8x1xf32> to vector<8x32xf32>
    %103 = arith.subf %86, %102 : vector<8x32xf32>
    %cst_48 = arith.constant 9.99999996E-13 : f32
    %104 = vector.broadcast %cst_48 : f32 to vector<8x1xf32>
    %105 = arith.addf %101, %104 : vector<8x1xf32>
    %106 = math.rsqrt %105 : vector<8x1xf32>
    %107 = vector.broadcast %106 : vector<8x1xf32> to vector<8x32xf32>
    %108 = arith.mulf %103, %107 : vector<8x32xf32>
    %109 = vector.broadcast %88 : vector<1x32xf32> to vector<8x32xf32>
    %110 = arith.mulf %108, %109 : vector<8x32xf32>
    %111 = vector.broadcast %90 : vector<1x32xf32> to vector<8x32xf32>
    %112 = arith.addf %110, %111 : vector<8x32xf32>
    %c0_49 = arith.constant 0 : index
    %c0_50 = arith.constant 0 : index
    %c0_51 = arith.constant 0 : index
    %113 = vector.load %arg11[%c0_49, %c0_50, %c0_51] : memref<2x32x64xf32, #tpu.memory_space<vmem>>, vector<1x32x64xf32>
    %114 = vector.shape_cast %113 : vector<1x32x64xf32> to vector<32x64xf32>
    %cst_52 = arith.constant dense<0.000000e+00> : vector<8x64xf32>
    %115 = tpu.matmul %112, %114, %cst_52 {dimension_numbers = #tpu.dot_dimension_numbers<[1], [0], [0], [1], [0, 0, 1, 1], [], []>} : vector<8x32xf32>, vector<32x64xf32>, vector<8x64xf32> -> vector<8x64xf32>
    %c0_53 = arith.constant 0 : index
    %c0_54 = arith.constant 0 : index
    %c0_55 = arith.constant 0 : index
    %116 = vector.load %arg12[%c0_53, %c0_54, %c0_55] : memref<2x1x64xf32, #tpu.memory_space<vmem>>, vector<1x1x64xf32>
    %117 = vector.shape_cast %116 : vector<1x1x64xf32> to vector<1x64xf32>
    %118 = vector.broadcast %117 : vector<1x64xf32> to vector<8x64xf32>
    %119 = arith.addf %115, %118 : vector<8x64xf32>
    %cst_56 = arith.constant 5.000000e-01 : f32
    %120 = vector.broadcast %cst_56 : f32 to vector<8x64xf32>
    %121 = arith.mulf %120, %119 : vector<8x64xf32>
    %cst_57 = arith.constant 0.707106769 : f32
    %122 = vector.broadcast %cst_57 : f32 to vector<8x64xf32>
    %123 = arith.mulf %119, %122 : vector<8x64xf32>
    %124 = math.erf %123 : vector<8x64xf32>
    %cst_58 = arith.constant 1.000000e+00 : f32
    %125 = vector.broadcast %cst_58 : f32 to vector<8x64xf32>
    %126 = arith.addf %125, %124 : vector<8x64xf32>
    %127 = arith.mulf %121, %126 : vector<8x64xf32>
    %c0_59 = arith.constant 0 : index
    %c0_60 = arith.constant 0 : index
    %c0_61 = arith.constant 0 : index
    %128 = vector.load %arg13[%c0_59, %c0_60, %c0_61] : memref<2x64x32xf32, #tpu.memory_space<vmem>>, vector<1x64x32xf32>
    %129 = vector.shape_cast %128 : vector<1x64x32xf32> to vector<64x32xf32>
    %cst_62 = arith.constant dense<0.000000e+00> : vector<8x32xf32>
    %130 = tpu.matmul %127, %129, %cst_62 {dimension_numbers = #tpu.dot_dimension_numbers<[1], [0], [0], [1], [0, 0, 1, 1], [], []>} : vector<8x64xf32>, vector<64x32xf32>, vector<8x32xf32> -> vector<8x32xf32>
    %c0_63 = arith.constant 0 : index
    %c0_64 = arith.constant 0 : index
    %c0_65 = arith.constant 0 : index
    %131 = vector.load %arg14[%c0_63, %c0_64, %c0_65] : memref<2x1x32xf32, #tpu.memory_space<vmem>>, vector<1x1x32xf32>
    %132 = vector.shape_cast %131 : vector<1x1x32xf32> to vector<1x32xf32>
    %133 = vector.broadcast %132 : vector<1x32xf32> to vector<8x32xf32>
    %134 = arith.addf %130, %133 : vector<8x32xf32>
    %135 = arith.addf %134, %112 : vector<8x32xf32>
    %c0_66 = arith.constant 0 : index
    %c0_67 = arith.constant 0 : index
    %c0_68 = arith.constant 0 : index
    %136 = vector.load %arg15[%c0_66, %c0_67, %c0_68] : memref<2x1x32xf32, #tpu.memory_space<vmem>>, vector<1x1x32xf32>
    %137 = vector.shape_cast %136 : vector<1x1x32xf32> to vector<1x32xf32>
    %c0_69 = arith.constant 0 : index
    %c0_70 = arith.constant 0 : index
    %c0_71 = arith.constant 0 : index
    %138 = vector.load %arg16[%c0_69, %c0_70, %c0_71] : memref<2x1x32xf32, #tpu.memory_space<vmem>>, vector<1x1x32xf32>
    %139 = vector.shape_cast %138 : vector<1x1x32xf32> to vector<1x32xf32>
    %cst_72 = arith.constant dense<0.000000e+00> : vector<8xf32>
    %140 = vector.multi_reduction <add>, %135, %cst_72 [1] : vector<8x32xf32> to vector<8xf32>
    %141 = vector.shape_cast %140 : vector<8xf32> to vector<8x1xf32>
    %cst_73 = arith.constant 3.200000e+01 : f32
    %142 = vector.broadcast %cst_73 : f32 to vector<8x1xf32>
    %143 = arith.divf %141, %142 : vector<8x1xf32>
    %144 = vector.broadcast %143 : vector<8x1xf32> to vector<8x32xf32>
    %145 = arith.subf %135, %144 : vector<8x32xf32>
    %146 = arith.mulf %145, %145 : vector<8x32xf32>
    %cst_74 = arith.constant dense<0.000000e+00> : vector<8xf32>
    %147 = vector.multi_reduction <add>, %146, %cst_74 [1] : vector<8x32xf32> to vector<8xf32>
    %148 = vector.shape_cast %147 : vector<8xf32> to vector<8x1xf32>
    %cst_75 = arith.constant 3.200000e+01 : f32
    %149 = vector.broadcast %cst_75 : f32 to vector<8x1xf32>
    %150 = arith.divf %148, %149 : vector<8x1xf32>
    %151 = vector.broadcast %143 : vector<8x1xf32> to vector<8x32xf32>
    %152 = arith.subf %135, %151 : vector<8x32xf32>
    %cst_76 = arith.constant 9.99999996E-13 : f32
    %153 = vector.broadcast %cst_76 : f32 to vector<8x1xf32>
    %154 = arith.addf %150, %153 : vector<8x1xf32>
    %155 = math.rsqrt %154 : vector<8x1xf32>
    %156 = vector.broadcast %155 : vector<8x1xf32> to vector<8x32xf32>
    %157 = arith.mulf %152, %156 : vector<8x32xf32>
    %158 = vector.broadcast %137 : vector<1x32xf32> to vector<8x32xf32>
    %159 = arith.mulf %157, %158 : vector<8x32xf32>
    %160 = vector.broadcast %139 : vector<1x32xf32> to vector<8x32xf32>
    %161 = arith.addf %159, %160 : vector<8x32xf32>
    %c1 = arith.constant 1 : index
    %c0_77 = arith.constant 0 : index
    %c0_78 = arith.constant 0 : index
    %162 = vector.load %arg5[%c1, %c0_77, %c0_78] : memref<2x32x96xf32, #tpu.memory_space<vmem>>, vector<1x32x96xf32>
    %163 = vector.shape_cast %162 : vector<1x32x96xf32> to vector<32x96xf32>
    %cst_79 = arith.constant dense<0.000000e+00> : vector<8x96xf32>
    %164 = tpu.matmul %161, %163, %cst_79 {dimension_numbers = #tpu.dot_dimension_numbers<[1], [0], [0], [1], [0, 0, 1, 1], [], []>} : vector<8x32xf32>, vector<32x96xf32>, vector<8x96xf32> -> vector<8x96xf32>
    %c1_80 = arith.constant 1 : index
    %c0_81 = arith.constant 0 : index
    %c0_82 = arith.constant 0 : index
    %165 = vector.load %arg6[%c1_80, %c0_81, %c0_82] : memref<2x1x96xf32, #tpu.memory_space<vmem>>, vector<1x1x96xf32>
    %166 = vector.shape_cast %165 : vector<1x1x96xf32> to vector<1x96xf32>
    %167 = vector.broadcast %166 : vector<1x96xf32> to vector<8x96xf32>
    %168 = arith.addf %164, %167 : vector<8x96xf32>
    %169 = vector.extract_strided_slice %168 {offsets = [0, 0], sizes = [8, 16], strides = [1, 1]} : vector<8x96xf32> to vector<8x16xf32>
    %170 = vector.extract_strided_slice %168 {offsets = [0, 32], sizes = [8, 16], strides = [1, 1]} : vector<8x96xf32> to vector<8x16xf32>
    %171 = vector.extract_strided_slice %168 {offsets = [0, 64], sizes = [8, 16], strides = [1, 1]} : vector<8x96xf32> to vector<8x16xf32>
    %172 = tpu.transpose %170, [1, 0] : vector<8x16xf32> -> vector<16x8xf32>
    %cst_83 = arith.constant dense<0.000000e+00> : vector<8x8xf32>
    %173 = tpu.matmul %169, %172, %cst_83 {dimension_numbers = #tpu.dot_dimension_numbers<[1], [0], [0], [1], [0, 0, 1, 1], [], []>} : vector<8x16xf32>, vector<16x8xf32>, vector<8x8xf32> -> vector<8x8xf32>
    %cst_84 = arith.constant 2.500000e-01 : f32
    %174 = vector.broadcast %cst_84 : f32 to vector<8x8xf32>
    %175 = arith.mulf %173, %174 : vector<8x8xf32>
    %176 = vector.broadcast %30 : vector<1x8xf32> to vector<8x8xf32>
    %177 = arith.addf %175, %176 : vector<8x8xf32>
    %cst_85 = arith.constant dense<0xFF800000> : vector<8xf32>
    %178 = vector.multi_reduction <maximumf>, %177, %cst_85 [1] : vector<8x8xf32> to vector<8xf32>
    %179 = vector.shape_cast %178 : vector<8xf32> to vector<8x1xf32>
    %180 = vector.broadcast %179 : vector<8x1xf32> to vector<8x8xf32>
    %181 = arith.subf %177, %180 : vector<8x8xf32>
    %182 = math.exp %181 : vector<8x8xf32>
    %cst_86 = arith.constant dense<0.000000e+00> : vector<8xf32>
    %183 = vector.multi_reduction <add>, %182, %cst_86 [1] : vector<8x8xf32> to vector<8xf32>
    %184 = vector.shape_cast %183 : vector<8xf32> to vector<8x1xf32>
    %185 = tpu.reciprocal %184 {approx = true} : vector<8x1xf32> -> vector<8x1xf32>
    %186 = vector.broadcast %185 : vector<8x1xf32> to vector<8x8xf32>
    %187 = arith.mulf %182, %186 : vector<8x8xf32>
    %cst_87 = arith.constant dense<0.000000e+00> : vector<8x16xf32>
    %188 = tpu.matmul %187, %171, %cst_87 {dimension_numbers = #tpu.dot_dimension_numbers<[1], [0], [0], [1], [0, 0, 1, 1], [], []>} : vector<8x8xf32>, vector<8x16xf32>, vector<8x16xf32> -> vector<8x16xf32>
    %189 = vector.extract_strided_slice %168 {offsets = [0, 16], sizes = [8, 16], strides = [1, 1]} : vector<8x96xf32> to vector<8x16xf32>
    %190 = vector.extract_strided_slice %168 {offsets = [0, 48], sizes = [8, 16], strides = [1, 1]} : vector<8x96xf32> to vector<8x16xf32>
    %191 = vector.extract_strided_slice %168 {offsets = [0, 80], sizes = [8, 16], strides = [1, 1]} : vector<8x96xf32> to vector<8x16xf32>
    %192 = tpu.transpose %190, [1, 0] : vector<8x16xf32> -> vector<16x8xf32>
    %cst_88 = arith.constant dense<0.000000e+00> : vector<8x8xf32>
    %193 = tpu.matmul %189, %192, %cst_88 {dimension_numbers = #tpu.dot_dimension_numbers<[1], [0], [0], [1], [0, 0, 1, 1], [], []>} : vector<8x16xf32>, vector<16x8xf32>, vector<8x8xf32> -> vector<8x8xf32>
    %cst_89 = arith.constant 2.500000e-01 : f32
    %194 = vector.broadcast %cst_89 : f32 to vector<8x8xf32>
    %195 = arith.mulf %193, %194 : vector<8x8xf32>
    %196 = vector.broadcast %30 : vector<1x8xf32> to vector<8x8xf32>
    %197 = arith.addf %195, %196 : vector<8x8xf32>
    %cst_90 = arith.constant dense<0xFF800000> : vector<8xf32>
    %198 = vector.multi_reduction <maximumf>, %197, %cst_90 [1] : vector<8x8xf32> to vector<8xf32>
    %199 = vector.shape_cast %198 : vector<8xf32> to vector<8x1xf32>
    %200 = vector.broadcast %199 : vector<8x1xf32> to vector<8x8xf32>
    %201 = arith.subf %197, %200 : vector<8x8xf32>
    %202 = math.exp %201 : vector<8x8xf32>
    %cst_91 = arith.constant dense<0.000000e+00> : vector<8xf32>
    %203 = vector.multi_reduction <add>, %202, %cst_91 [1] : vector<8x8xf32> to vector<8xf32>
    %204 = vector.shape_cast %203 : vector<8xf32> to vector<8x1xf32>
    %205 = tpu.reciprocal %204 {approx = true} : vector<8x1xf32> -> vector<8x1xf32>
    %206 = vector.broadcast %205 : vector<8x1xf32> to vector<8x8xf32>
    %207 = arith.mulf %202, %206 : vector<8x8xf32>
    %cst_92 = arith.constant dense<0.000000e+00> : vector<8x16xf32>
    %208 = tpu.matmul %207, %191, %cst_92 {dimension_numbers = #tpu.dot_dimension_numbers<[1], [0], [0], [1], [0, 0, 1, 1], [], []>} : vector<8x8xf32>, vector<8x16xf32>, vector<8x16xf32> -> vector<8x16xf32>
    %209 = tpu.concatenate %188, %208 in 1 : vector<8x16xf32>, vector<8x16xf32> -> vector<8x32xf32>
    %c1_93 = arith.constant 1 : index
    %c0_94 = arith.constant 0 : index
    %c0_95 = arith.constant 0 : index
    %210 = vector.load %arg7[%c1_93, %c0_94, %c0_95] : memref<2x32x32xf32, #tpu.memory_space<vmem>>, vector<1x32x32xf32>
    %211 = vector.shape_cast %210 : vector<1x32x32xf32> to vector<32x32xf32>
    %cst_96 = arith.constant dense<0.000000e+00> : vector<8x32xf32>
    %212 = tpu.matmul %209, %211, %cst_96 {dimension_numbers = #tpu.dot_dimension_numbers<[1], [0], [0], [1], [0, 0, 1, 1], [], []>} : vector<8x32xf32>, vector<32x32xf32>, vector<8x32xf32> -> vector<8x32xf32>
    %c1_97 = arith.constant 1 : index
    %c0_98 = arith.constant 0 : index
    %c0_99 = arith.constant 0 : index
    %213 = vector.load %arg8[%c1_97, %c0_98, %c0_99] : memref<2x1x32xf32, #tpu.memory_space<vmem>>, vector<1x1x32xf32>
    %214 = vector.shape_cast %213 : vector<1x1x32xf32> to vector<1x32xf32>
    %215 = vector.broadcast %214 : vector<1x32xf32> to vector<8x32xf32>
    %216 = arith.addf %212, %215 : vector<8x32xf32>
    %217 = arith.addf %216, %161 : vector<8x32xf32>
    %c1_100 = arith.constant 1 : index
    %c0_101 = arith.constant 0 : index
    %c0_102 = arith.constant 0 : index
    %218 = vector.load %arg9[%c1_100, %c0_101, %c0_102] : memref<2x1x32xf32, #tpu.memory_space<vmem>>, vector<1x1x32xf32>
    %219 = vector.shape_cast %218 : vector<1x1x32xf32> to vector<1x32xf32>
    %c1_103 = arith.constant 1 : index
    %c0_104 = arith.constant 0 : index
    %c0_105 = arith.constant 0 : index
    %220 = vector.load %arg10[%c1_103, %c0_104, %c0_105] : memref<2x1x32xf32, #tpu.memory_space<vmem>>, vector<1x1x32xf32>
    %221 = vector.shape_cast %220 : vector<1x1x32xf32> to vector<1x32xf32>
    %cst_106 = arith.constant dense<0.000000e+00> : vector<8xf32>
    %222 = vector.multi_reduction <add>, %217, %cst_106 [1] : vector<8x32xf32> to vector<8xf32>
    %223 = vector.shape_cast %222 : vector<8xf32> to vector<8x1xf32>
    %cst_107 = arith.constant 3.200000e+01 : f32
    %224 = vector.broadcast %cst_107 : f32 to vector<8x1xf32>
    %225 = arith.divf %223, %224 : vector<8x1xf32>
    %226 = vector.broadcast %225 : vector<8x1xf32> to vector<8x32xf32>
    %227 = arith.subf %217, %226 : vector<8x32xf32>
    %228 = arith.mulf %227, %227 : vector<8x32xf32>
    %cst_108 = arith.constant dense<0.000000e+00> : vector<8xf32>
    %229 = vector.multi_reduction <add>, %228, %cst_108 [1] : vector<8x32xf32> to vector<8xf32>
    %230 = vector.shape_cast %229 : vector<8xf32> to vector<8x1xf32>
    %cst_109 = arith.constant 3.200000e+01 : f32
    %231 = vector.broadcast %cst_109 : f32 to vector<8x1xf32>
    %232 = arith.divf %230, %231 : vector<8x1xf32>
    %233 = vector.broadcast %225 : vector<8x1xf32> to vector<8x32xf32>
    %234 = arith.subf %217, %233 : vector<8x32xf32>
    %cst_110 = arith.constant 9.99999996E-13 : f32
    %235 = vector.broadcast %cst_110 : f32 to vector<8x1xf32>
    %236 = arith.addf %232, %235 : vector<8x1xf32>
    %237 = math.rsqrt %236 : vector<8x1xf32>
    %238 = vector.broadcast %237 : vector<8x1xf32> to vector<8x32xf32>
    %239 = arith.mulf %234, %238 : vector<8x32xf32>
    %240 = vector.broadcast %219 : vector<1x32xf32> to vector<8x32xf32>
    %241 = arith.mulf %239, %240 : vector<8x32xf32>
    %242 = vector.broadcast %221 : vector<1x32xf32> to vector<8x32xf32>
    %243 = arith.addf %241, %242 : vector<8x32xf32>
    %c1_111 = arith.constant 1 : index
    %c0_112 = arith.constant 0 : index
    %c0_113 = arith.constant 0 : index
    %244 = vector.load %arg11[%c1_111, %c0_112, %c0_113] : memref<2x32x64xf32, #tpu.memory_space<vmem>>, vector<1x32x64xf32>
    %245 = vector.shape_cast %244 : vector<1x32x64xf32> to vector<32x64xf32>
    %cst_114 = arith.constant dense<0.000000e+00> : vector<8x64xf32>
    %246 = tpu.matmul %243, %245, %cst_114 {dimension_numbers = #tpu.dot_dimension_numbers<[1], [0], [0], [1], [0, 0, 1, 1], [], []>} : vector<8x32xf32>, vector<32x64xf32>, vector<8x64xf32> -> vector<8x64xf32>
    %c1_115 = arith.constant 1 : index
    %c0_116 = arith.constant 0 : index
    %c0_117 = arith.constant 0 : index
    %247 = vector.load %arg12[%c1_115, %c0_116, %c0_117] : memref<2x1x64xf32, #tpu.memory_space<vmem>>, vector<1x1x64xf32>
    %248 = vector.shape_cast %247 : vector<1x1x64xf32> to vector<1x64xf32>
    %249 = vector.broadcast %248 : vector<1x64xf32> to vector<8x64xf32>
    %250 = arith.addf %246, %249 : vector<8x64xf32>
    %cst_118 = arith.constant 5.000000e-01 : f32
    %251 = vector.broadcast %cst_118 : f32 to vector<8x64xf32>
    %252 = arith.mulf %251, %250 : vector<8x64xf32>
    %cst_119 = arith.constant 0.707106769 : f32
    %253 = vector.broadcast %cst_119 : f32 to vector<8x64xf32>
    %254 = arith.mulf %250, %253 : vector<8x64xf32>
    %255 = math.erf %254 : vector<8x64xf32>
    %cst_120 = arith.constant 1.000000e+00 : f32
    %256 = vector.broadcast %cst_120 : f32 to vector<8x64xf32>
    %257 = arith.addf %256, %255 : vector<8x64xf32>
    %258 = arith.mulf %252, %257 : vector<8x64xf32>
    %c1_121 = arith.constant 1 : index
    %c0_122 = arith.constant 0 : index
    %c0_123 = arith.constant 0 : index
    %259 = vector.load %arg13[%c1_121, %c0_122, %c0_123] : memref<2x64x32xf32, #tpu.memory_space<vmem>>, vector<1x64x32xf32>
    %260 = vector.shape_cast %259 : vector<1x64x32xf32> to vector<64x32xf32>
    %cst_124 = arith.constant dense<0.000000e+00> : vector<8x32xf32>
    %261 = tpu.matmul %258, %260, %cst_124 {dimension_numbers = #tpu.dot_dimension_numbers<[1], [0], [0], [1], [0, 0, 1, 1], [], []>} : vector<8x64xf32>, vector<64x32xf32>, vector<8x32xf32> -> vector<8x32xf32>
    %c1_125 = arith.constant 1 : index
    %c0_126 = arith.constant 0 : index
    %c0_127 = arith.constant 0 : index
    %262 = vector.load %arg14[%c1_125, %c0_126, %c0_127] : memref<2x1x32xf32, #tpu.memory_space<vmem>>, vector<1x1x32xf32>
    %263 = vector.shape_cast %262 : vector<1x1x32xf32> to vector<1x32xf32>
    %264 = vector.broadcast %263 : vector<1x32xf32> to vector<8x32xf32>
    %265 = arith.addf %261, %264 : vector<8x32xf32>
    %266 = arith.addf %265, %243 : vector<8x32xf32>
    %c1_128 = arith.constant 1 : index
    %c0_129 = arith.constant 0 : index
    %c0_130 = arith.constant 0 : index
    %267 = vector.load %arg15[%c1_128, %c0_129, %c0_130] : memref<2x1x32xf32, #tpu.memory_space<vmem>>, vector<1x1x32xf32>
    %268 = vector.shape_cast %267 : vector<1x1x32xf32> to vector<1x32xf32>
    %c1_131 = arith.constant 1 : index
    %c0_132 = arith.constant 0 : index
    %c0_133 = arith.constant 0 : index
    %269 = vector.load %arg16[%c1_131, %c0_132, %c0_133] : memref<2x1x32xf32, #tpu.memory_space<vmem>>, vector<1x1x32xf32>
    %270 = vector.shape_cast %269 : vector<1x1x32xf32> to vector<1x32xf32>
    %cst_134 = arith.constant dense<0.000000e+00> : vector<8xf32>
    %271 = vector.multi_reduction <add>, %266, %cst_134 [1] : vector<8x32xf32> to vector<8xf32>
    %272 = vector.shape_cast %271 : vector<8xf32> to vector<8x1xf32>
    %cst_135 = arith.constant 3.200000e+01 : f32
    %273 = vector.broadcast %cst_135 : f32 to vector<8x1xf32>
    %274 = arith.divf %272, %273 : vector<8x1xf32>
    %275 = vector.broadcast %274 : vector<8x1xf32> to vector<8x32xf32>
    %276 = arith.subf %266, %275 : vector<8x32xf32>
    %277 = arith.mulf %276, %276 : vector<8x32xf32>
    %cst_136 = arith.constant dense<0.000000e+00> : vector<8xf32>
    %278 = vector.multi_reduction <add>, %277, %cst_136 [1] : vector<8x32xf32> to vector<8xf32>
    %279 = vector.shape_cast %278 : vector<8xf32> to vector<8x1xf32>
    %cst_137 = arith.constant 3.200000e+01 : f32
    %280 = vector.broadcast %cst_137 : f32 to vector<8x1xf32>
    %281 = arith.divf %279, %280 : vector<8x1xf32>
    %282 = vector.broadcast %274 : vector<8x1xf32> to vector<8x32xf32>
    %283 = arith.subf %266, %282 : vector<8x32xf32>
    %cst_138 = arith.constant 9.99999996E-13 : f32
    %284 = vector.broadcast %cst_138 : f32 to vector<8x1xf32>
    %285 = arith.addf %281, %284 : vector<8x1xf32>
    %286 = math.rsqrt %285 : vector<8x1xf32>
    %287 = vector.broadcast %286 : vector<8x1xf32> to vector<8x32xf32>
    %288 = arith.mulf %283, %287 : vector<8x32xf32>
    %289 = vector.broadcast %268 : vector<1x32xf32> to vector<8x32xf32>
    %290 = arith.mulf %288, %289 : vector<8x32xf32>
    %291 = vector.broadcast %270 : vector<1x32xf32> to vector<8x32xf32>
    %292 = arith.addf %290, %291 : vector<8x32xf32>
    %c0_139 = arith.constant 0 : index
    %c0_140 = arith.constant 0 : index
    %293 = vector.load %arg17[%c0_139, %c0_140] : memref<32x32xf32, #tpu.memory_space<vmem>>, vector<32x32xf32>
    %cst_141 = arith.constant dense<0.000000e+00> : vector<8x32xf32>
    %294 = tpu.matmul %292, %293, %cst_141 {dimension_numbers = #tpu.dot_dimension_numbers<[1], [0], [0], [1], [0, 0, 1, 1], [], []>} : vector<8x32xf32>, vector<32x32xf32>, vector<8x32xf32> -> vector<8x32xf32>
    %c0_142 = arith.constant 0 : index
    %c0_143 = arith.constant 0 : index
    %295 = vector.load %arg18[%c0_142, %c0_143] : memref<1x32xf32, #tpu.memory_space<vmem>>, vector<1x32xf32>
    %296 = vector.broadcast %295 : vector<1x32xf32> to vector<8x32xf32>
    %297 = arith.addf %294, %296 : vector<8x32xf32>
    %298 = math.tanh %297 : vector<8x32xf32>
    %c0_144 = arith.constant 0 : index
    %c0_145 = arith.constant 0 : index
    %299 = vector.load %arg19[%c0_144, %c0_145] : memref<32x16xf32, #tpu.memory_space<vmem>>, vector<32x16xf32>
    %cst_146 = arith.constant dense<0.000000e+00> : vector<8x16xf32>
    %300 = tpu.matmul %298, %299, %cst_146 {dimension_numbers = #tpu.dot_dimension_numbers<[1], [0], [0], [1], [0, 0, 1, 1], [], []>} : vector<8x32xf32>, vector<32x16xf32>, vector<8x16xf32> -> vector<8x16xf32>
    %c0_147 = arith.constant 0 : index
    %c0_148 = arith.constant 0 : index
    %301 = vector.load %arg20[%c0_147, %c0_148] : memref<1x16xf32, #tpu.memory_space<vmem>>, vector<1x16xf32>
    %302 = vector.broadcast %301 : vector<1x16xf32> to vector<8x16xf32>
    %303 = arith.addf %300, %302 : vector<8x16xf32>
    %cst_149 = arith.constant 0.000000e+00 : f32
    %304 = vector.broadcast %cst_149 : f32 to vector<8x16xf32>
    %305 = arith.maximumf %303, %304 : vector<8x16xf32>
    %c0_150 = arith.constant 0 : index
    %c0_151 = arith.constant 0 : index
    %306 = vector.load %arg21[%c0_150, %c0_151] : memref<1x16xf32, #tpu.memory_space<vmem>>, vector<1x16xf32>
    %c0_152 = arith.constant 0 : index
    %c0_153 = arith.constant 0 : index
    %307 = vector.load %arg22[%c0_152, %c0_153] : memref<1x16xf32, #tpu.memory_space<vmem>>, vector<1x16xf32>
    %cst_154 = arith.constant dense<0.000000e+00> : vector<8xf32>
    %308 = vector.multi_reduction <add>, %305, %cst_154 [1] : vector<8x16xf32> to vector<8xf32>
    %309 = vector.shape_cast %308 : vector<8xf32> to vector<8x1xf32>
    %cst_155 = arith.constant 1.600000e+01 : f32
    %310 = vector.broadcast %cst_155 : f32 to vector<8x1xf32>
    %311 = arith.divf %309, %310 : vector<8x1xf32>
    %312 = vector.broadcast %311 : vector<8x1xf32> to vector<8x16xf32>
    %313 = arith.subf %305, %312 : vector<8x16xf32>
    %314 = arith.mulf %313, %313 : vector<8x16xf32>
    %cst_156 = arith.constant dense<0.000000e+00> : vector<8xf32>
    %315 = vector.multi_reduction <add>, %314, %cst_156 [1] : vector<8x16xf32> to vector<8xf32>
    %316 = vector.shape_cast %315 : vector<8xf32> to vector<8x1xf32>
    %cst_157 = arith.constant 1.600000e+01 : f32
    %317 = vector.broadcast %cst_157 : f32 to vector<8x1xf32>
    %318 = arith.divf %316, %317 : vector<8x1xf32>
    %319 = vector.broadcast %311 : vector<8x1xf32> to vector<8x16xf32>
    %320 = arith.subf %305, %319 : vector<8x16xf32>
    %cst_158 = arith.constant 9.99999974E-6 : f32
    %321 = vector.broadcast %cst_158 : f32 to vector<8x1xf32>
    %322 = arith.addf %318, %321 : vector<8x1xf32>
    %323 = math.rsqrt %322 : vector<8x1xf32>
    %324 = vector.broadcast %323 : vector<8x1xf32> to vector<8x16xf32>
    %325 = arith.mulf %320, %324 : vector<8x16xf32>
    %326 = vector.broadcast %306 : vector<1x16xf32> to vector<8x16xf32>
    %327 = arith.mulf %325, %326 : vector<8x16xf32>
    %328 = vector.broadcast %307 : vector<1x16xf32> to vector<8x16xf32>
    %329 = arith.addf %327, %328 : vector<8x16xf32>
    %c0_159 = arith.constant 0 : index
    %c0_160 = arith.constant 0 : index
    %330 = vector.load %arg23[%c0_159, %c0_160] : memref<16x128xf32, #tpu.memory_space<vmem>>, vector<16x128xf32>
    %cst_161 = arith.constant dense<0.000000e+00> : vector<8x128xf32>
    %331 = tpu.matmul %329, %330, %cst_161 {dimension_numbers = #tpu.dot_dimension_numbers<[1], [0], [0], [1], [0, 0, 1, 1], [], []>} : vector<8x16xf32>, vector<16x128xf32>, vector<8x128xf32> -> vector<8x128xf32>
    %c0_162 = arith.constant 0 : index
    %c0_163 = arith.constant 0 : index
    %332 = vector.load %arg24[%c0_162, %c0_163] : memref<1x128xf32, #tpu.memory_space<vmem>>, vector<1x128xf32>
    %333 = vector.broadcast %332 : vector<1x128xf32> to vector<8x128xf32>
    %334 = arith.addf %331, %333 : vector<8x128xf32>
    %335 = vector.shape_cast %334 : vector<8x128xf32> to vector<1x8x128xf32>
    %c0_164 = arith.constant 0 : index
    %c0_165 = arith.constant 0 : index
    %c0_166 = arith.constant 0 : index
    %336 = vector.load %arg25[%c0_164, %c0_165, %c0_166] : memref<1x8x128xf32, #tpu.memory_space<vmem>>, vector<1x8x128xf32>
    tpu.vector_store %arg25[%c0_164, %c0_165, %c0_166], %335 {strides = array<i32>} : memref<1x8x128xf32, #tpu.memory_space<vmem>>, vector<1x8x128xf32>,
    return
  }
  func.func @transform_0(%arg0: i32) -> (i32, i32) {
    %c0_i32 = arith.constant 0 : i32
    %c0_i32_0 = arith.constant 0 : i32
    return %arg0, %c0_i32 : i32, i32
  }
  func.func @transform_1(%arg0: i32) -> (i32, i32, i32) {
    %c0_i32 = arith.constant 0 : i32
    %c0_i32_0 = arith.constant 0 : i32
    %c0_i32_1 = arith.constant 0 : i32
    return %arg0, %c0_i32, %c0_i32_0 : i32, i32, i32
  }
  func.func @transform_2(%arg0: i32) -> (i32, i32) {
    %c0_i32 = arith.constant 0 : i32
    %c0_i32_0 = arith.constant 0 : i32
    %c0_i32_1 = arith.constant 0 : i32
    return %c0_i32, %c0_i32_0 : i32, i32
  }
  func.func @transform_3(%arg0: i32) -> (i32, i32) {
    %c0_i32 = arith.constant 0 : i32
    %c0_i32_0 = arith.constant 0 : i32
    %c0_i32_1 = arith.constant 0 : i32
    return %c0_i32, %c0_i32_0 : i32, i32
  }
  func.func @transform_4(%arg0: i32) -> (i32, i32, i32) {
    %c0_i32 = arith.constant 0 : i32
    %c0_i32_0 = arith.constant 0 : i32
    %c0_i32_1 = arith.constant 0 : i32
    %c0_i32_2 = arith.constant 0 : i32
    return %c0_i32, %c0_i32_0, %c0_i32_1 : i32, i32, i32
  }
  func.func @transform_5(%arg0: i32) -> (i32, i32, i32) {
    %c0_i32 = arith.constant 0 : i32
    %c0_i32_0 = arith.constant 0 : i32
    %c0_i32_1 = arith.constant 0 : i32
    %c0_i32_2 = arith.constant 0 : i32
    return %c0_i32, %c0_i32_0, %c0_i32_1 : i32, i32, i32
  }
  func.func @transform_6(%arg0: i32) -> (i32, i32, i32) {
    %c0_i32 = arith.constant 0 : i32
    %c0_i32_0 = arith.constant 0 : i32
    %c0_i32_1 = arith.constant 0 : i32
    %c0_i32_2 = arith.constant 0 : i32
    return %c0_i32, %c0_i32_0, %c0_i32_1 : i32, i32, i32
  }
  func.func @transform_7(%arg0: i32) -> (i32, i32, i32) {
    %c0_i32 = arith.constant 0 : i32
    %c0_i32_0 = arith.constant 0 : i32
    %c0_i32_1 = arith.constant 0 : i32
    %c0_i32_2 = arith.constant 0 : i32
    return %c0_i32, %c0_i32_0, %c0_i32_1 : i32, i32, i32
  }
  func.func @transform_8(%arg0: i32) -> (i32, i32, i32) {
    %c0_i32 = arith.constant 0 : i32
    %c0_i32_0 = arith.constant 0 : i32
    %c0_i32_1 = arith.constant 0 : i32
    %c0_i32_2 = arith.constant 0 : i32
    return %c0_i32, %c0_i32_0, %c0_i32_1 : i32, i32, i32
  }
  func.func @transform_9(%arg0: i32) -> (i32, i32, i32) {
    %c0_i32 = arith.constant 0 : i32
    %c0_i32_0 = arith.constant 0 : i32
    %c0_i32_1 = arith.constant 0 : i32
    %c0_i32_2 = arith.constant 0 : i32
    return %c0_i32, %c0_i32_0, %c0_i32_1 : i32, i32, i32
  }
  func.func @transform_10(%arg0: i32) -> (i32, i32, i32) {
    %c0_i32 = arith.constant 0 : i32
    %c0_i32_0 = arith.constant 0 : i32
    %c0_i32_1 = arith.constant 0 : i32
    %c0_i32_2 = arith.constant 0 : i32
    return %c0_i32, %c0_i32_0, %c0_i32_1 : i32, i32, i32
  }
  func.func @transform_11(%arg0: i32) -> (i32, i32, i32) {
    %c0_i32 = arith.constant 0 : i32
    %c0_i32_0 = arith.constant 0 : i32
    %c0_i32_1 = arith.constant 0 : i32
    %c0_i32_2 = arith.constant 0 : i32
    return %c0_i32, %c0_i32_0, %c0_i32_1 : i32, i32, i32
  }
  func.func @transform_12(%arg0: i32) -> (i32, i32, i32) {
    %c0_i32 = arith.constant 0 : i32
    %c0_i32_0 = arith.constant 0 : i32
    %c0_i32_1 = arith.constant 0 : i32
    %c0_i32_2 = arith.constant 0 : i32
    return %c0_i32, %c0_i32_0, %c0_i32_1 : i32, i32, i32
  }
  func.func @transform_13(%arg0: i32) -> (i32, i32, i32) {
    %c0_i32 = arith.constant 0 : i32
    %c0_i32_0 = arith.constant 0 : i32
    %c0_i32_1 = arith.constant 0 : i32
    %c0_i32_2 = arith.constant 0 : i32
    return %c0_i32, %c0_i32_0, %c0_i32_1 : i32, i32, i32
  }
  func.func @transform_14(%arg0: i32) -> (i32, i32, i32) {
    %c0_i32 = arith.constant 0 : i32
    %c0_i32_0 = arith.constant 0 : i32
    %c0_i32_1 = arith.constant 0 : i32
    %c0_i32_2 = arith.constant 0 : i32
    return %c0_i32, %c0_i32_0, %c0_i32_1 : i32, i32, i32
  }
  func.func @transform_15(%arg0: i32) -> (i32, i32, i32) {
    %c0_i32 = arith.constant 0 : i32
    %c0_i32_0 = arith.constant 0 : i32
    %c0_i32_1 = arith.constant 0 : i32
    %c0_i32_2 = arith.constant 0 : i32
    return %c0_i32, %c0_i32_0, %c0_i32_1 : i32, i32, i32
  }
  func.func @transform_16(%arg0: i32) -> (i32, i32) {
    %c0_i32 = arith.constant 0 : i32
    %c0_i32_0 = arith.constant 0 : i32
    %c0_i32_1 = arith.constant 0 : i32
    return %c0_i32, %c0_i32_0 : i32, i32
  }
  func.func @transform_17(%arg0: i32) -> (i32, i32) {
    %c0_i32 = arith.constant 0 : i32
    %c0_i32_0 = arith.constant 0 : i32
    %c0_i32_1 = arith.constant 0 : i32
    return %c0_i32, %c0_i32_0 : i32, i32
  }
  func.func @transform_18(%arg0: i32) -> (i32, i32) {
    %c0_i32 = arith.constant 0 : i32
    %c0_i32_0 = arith.constant 0 : i32
    %c0_i32_1 = arith.constant 0 : i32
    return %c0_i32, %c0_i32_0 : i32, i32
  }
  func.func @transform_19(%arg0: i32) -> (i32, i32) {
    %c0_i32 = arith.constant 0 : i32
    %c0_i32_0 = arith.constant 0 : i32
    %c0_i32_1 = arith.constant 0 : i32
    return %c0_i32, %c0_i32_0 : i32, i32
  }
  func.func @transform_20(%arg0: i32) -> (i32, i32) {
    %c0_i32 = arith.constant 0 : i32
    %c0_i32_0 = arith.constant 0 : i32
    %c0_i32_1 = arith.constant 0 : i32
    return %c0_i32, %c0_i32_0 : i32, i32
  }
  func.func @transform_21(%arg0: i32) -> (i32, i32) {
    %c0_i32 = arith.constant 0 : i32
    %c0_i32_0 = arith.constant 0 : i32
    %c0_i32_1 = arith.constant 0 : i32
    return %c0_i32, %c0_i32_0 : i32, i32
  }
  func.func @transform_22(%arg0: i32) -> (i32, i32) {
    %c0_i32 = arith.constant 0 : i32
    %c0_i32_0 = arith.constant 0 : i32
    %c0_i32_1 = arith.constant 0 : i32
    return %c0_i32, %c0_i32_0 : i32, i32
  }
  func.func @transform_23(%arg0: i32) -> (i32, i32) {
    %c0_i32 = arith.constant 0 : i32
    %c0_i32_0 = arith.constant 0 : i32
    %c0_i32_1 = arith.constant 0 : i32
    return %c0_i32, %c0_i32_0 : i32, i32
  }
  func.func @transform_24(%arg0: i32) -> (i32, i32, i32) {
    %c0_i32 = arith.constant 0 : i32
    %c0_i32_0 = arith.constant 0 : i32
    %c0_i32_1 = arith.constant 0 : i32
    return %arg0, %c0_i32, %c0_i32_0 : i32, i32, i32
  }
}

</mosaic_0001>

<bundles_post_ra>
// kernel: sentiment_classifier_forward.1
= control target key start
LH: loop header
LB: loop body
LE: loop exit
PB: predicated region body
PF: predicated region fallthrough
CT: control target
= control target key end

     0   :  { %s2374_s0 = inlined_call_operand.vmem [shape: f32[16,32], index: 0, kind: input, shape index: {}]   ;;  %s2375_s1 = inlined_call_operand.vmem [shape: f32[2,1,8], index: 1, kind: input, shape index: {}]   ;;  %s2376_s2 = inlined_call_operand.vmem [shape: f32[1,32], index: 2, kind: input, shape index: {}]   ;;  %s2377_s3 = inlined_call_operand.vmem [shape: f32[1,32], index: 3, kind: input, shape index: {}]   ;;  %s2378_s4 = inlined_call_operand.vmem [shape: f32[2,32,96], index: 4, kind: input, shape index: {}]   ;;  %s2379_s5 = inlined_call_operand.vmem [shape: f32[2,1,96], index: 5, kind: input, shape index: {}]   ;;  %s2380_s6 = inlined_call_operand.vmem [shape: f32[2,32,32], index: 6, kind: input, shape index: {}]   ;;  %s2381_s7 = inlined_call_operand.vmem [shape: f32[2,1,32], index: 7, kind: input, shape index: {}]   ;;  %s2382_s8 = inlined_call_operand.vmem [shape: f32[2,1,32], index: 8, kind: input, shape index: {}]   ;;  %s2383_s9 = inlined_call_operand.vmem [shape: f32[2,1,32], index: 9, kind: input, shape index: {}]   ;;  %s2384_s10 = inlined_call_operand.vmem [shape: f32[2,32,64], index: 10, kind: input, shape index: {}]   ;;  %s2385_s11 = inlined_call_operand.vmem [shape: f32[2,1,64], index: 11, kind: input, shape index: {}]   ;;  %s2386_s12 = inlined_call_operand.vmem [shape: f32[2,64,32], index: 12, kind: input, shape index: {}]   ;;  %s2387_s13 = inlined_call_operand.vmem [shape: f32[2,1,32], index: 13, kind: input, shape index: {}]   ;;  %s2388_s14 = inlined_call_operand.vmem [shape: f32[2,1,32], index: 14, kind: input, shape index: {}]   ;;  %s2389_s15 = inlined_call_operand.vmem [shape: f32[2,1,32], index: 15, kind: input, shape index: {}]   ;;  %s2390_s16 = inlined_call_operand.vmem [shape: f32[32,32], index: 16, kind: input, shape index: {}]   ;;  %s2391_s17 = inlined_call_operand.vmem [shape: f32[1,32], index: 17, kind: input, shape index: {}]   ;;  %s2392_s18 = inlined_call_operand.vmem [shape: f32[32,16], index: 18, kind: input, shape index: {}]   ;;  %s2393_s19 = inlined_call_operand.vmem [shape: f32[1,16], index: 19, kind: input, shape index: {}]   ;;  %s2394_s20 = inlined_call_operand.vmem [shape: f32[1,16], index: 20, kind: input, shape index: {}]   ;;  %s2395_s21 = inlined_call_operand.vmem [shape: f32[1,16], index: 21, kind: input, shape index: {}]   ;;  %s2396_s22 = inlined_call_operand.vmem [shape: f32[16,128], index: 22, kind: input, shape index: {}]   ;;  %s2397_s23 = inlined_call_operand.vmem [shape: f32[1,128], index: 23, kind: input, shape index: {}]   ;;  %s2398_s24 = inlined_call_operand.vmem [shape: f32[2,8,128], index: 24, kind: output, shape index: {}]  }
   0x1   :  { %2413 = sst [smem:[#allocation2_spill]] %s2374_s0 }
   0x2   :  { %2414 = sst [smem:[#allocation3_spill]] %s2375_s1 }
   0x3   :  { %2415 = sst [smem:[#allocation4_spill]] %s2376_s2 }
   0x4   :  { %2416 = sst [smem:[#allocation5_spill]] %s2377_s3 }
   0x5   :  { %2417 = sst [smem:[#allocation6_spill]] %s2378_s4 }
   0x6   :  { %2418 = sst [smem:[#allocation7_spill]] %s2379_s5  ;;  %s2036_s5 = smov 0  }
   0x7   :  { %2419 = sst [smem:[#allocation8_spill]] %s2380_s6 }
   0x8   :  { %2420 = sst [smem:[#allocation9_spill]] %s2381_s7 }
   0x9   :  { %2421 = sst [smem:[#allocation10_spill]] %s2382_s8 }
   0xa LB: > { %s1756_s26 = sadd.s32 4294967295, %s1901_s5   ;;  %p1760_p0 = scmp.ge.s32.totalorder %s1901_s5, 1  ;;  %s1901_s5 = sphi %s2036_s5, %s34_s5  }
   0xb   : > { %p669_p1 = scmp.lt.s32.totalorder %s1901_s5, 3 }
   0xd   : > { %p670_p2 = pnand %p1760_p0, %p669_p1 }
   0xe   : > { %p736_p3 = scmp.lt.s32.totalorder (!%p670_p2), %s1756_s26, 1  ;;  %s2422_s2 = sld [smem:[#allocation2_spill]] (!%p670_p2) }
   0xf   : > { %673 = sbr.rel (%p670_p2) target bundleno = 4728 (0x1278), region = 116  ;;  %s2423_s30 = sld [smem:[#allocation6_spill]] (!%p670_p2) }
  0x10   : > { %s2425_s3 = sld [smem:[#allocation5_spill]] (!%p670_p2)  ;;  %s2407_s1 = smov (!%p670_p2), 112  }
  0x11   : > { %s2426_s4 = sld [smem:[#allocation7_spill]] (!%p670_p2)  ;;  %s2410_s28 = smov (!%p670_p2), 96  }
  0x12   : > { %s2409_s6 = smov (!%p670_p2), 80   ;;  %s2427_s0 = sld [smem:[#allocation3_spill]] (!%p670_p2) }
  0x13   : > { %s2405_s25 = smov (!%p670_p2), 64   ;;  %s2408_s8 = smov (!%p670_p2), 16  }
  0x14   : > { %s2439_s26 = smov (!%p736_p3, %s1756_s26), 1  ;;  %vm750_vm0 = vcmask 261120   ;;  %v1903_v2 = vmov 32.0   ;;  %vm825_vm5 = vcmask 130048   ;;  %vm855_vm6 = vcmask 64512  }
  0x15   : > { %s2404_s27 = sshll.u32 %s2439_s26, 3  ;;  %1857 = vrcp.f32 %v1903_v2  ;;  %v794_v14 = vld [vmem:[%s2423_s30 + $0x18] sm:$0xff]  ;;  %v793_v15 = vld [vmem:[%s2423_s30 + $0x10] sm:$0xff]  ;;  %v792_v16 = vld [vmem:[%s2423_s30 + $0x8] sm:$0xff]  ;;  %vm1116_vm14 = vcmask 523264  }
  0x16   : > { %s739_s29 = scalar_lea.vmem %s2422_s2, %s2404_s27  ;;  %814 = vmatpush.msra.mxu0 %v794_v14  ;;  %v791_v17 = vld [vmem:[%s2423_s30] sm:$0xff] }
  0x17   : > { %v747_v0 = vld [vmem:[%s739_s29] sm:$0xff]  ;;  %s2424_s29 = sld [smem:[#allocation4_spill]] }
  0x18   : > { %v751_v1 = vsel %vm750_vm0, %v747_v0, 0.0  ;;  %815 = vmatpush.msra.mxu0 %v793_v15  ;;  %v1835_v30 = vld [vmem:[%s2425_s3] ss:$0 sm:$0xff]  ;;  %s742_s7 = scalar_lea.vmem %s2427_s0, %s2439_s26  ;;  %s2406_s3 = smov 48  }
  0x19   : > { %752 = vadd.xlane.f32.xlu0 %v751_v1  ;;  %v1836_v33 = vld [vmem:[%s2426_s4] ss:$0 sm:$0xff]  ;;  %s2435_s0 = smov 64  }
  0x1a   : > { %816 = vmatpush.msra.mxu0 %v792_v16  ;;  %v788_v39 = vld [vmem:[%s742_s7] sm:$0x1] }
  0x1b   : > { %v1858_v3 = vpop.eup %1857  ;;  %v789_v40 = vsub.f32 1.0, %v788_v39 }
  0x1c   : > { %v755_v4 = vmul.f32 32.0, %v1858_v3  ;;  %vm759_vm1 = vweird.f32 %v1858_v3  ;;  %817 = vmatpush.msra.mxu0 %v791_v17 }
  0x1d   : > { %v1834_v27 = vld [vmem:[%s2424_s29] ss:$0 sm:$0xff]  ;;  %v790_v41 = vmul.f32 -10000.0, %v789_v40  ;;  %s2428_s29 = sld [smem:[#allocation8_spill]] }
  0x1e   : > { %v756_v5 = vsub.f32 1.0, %v755_v4  ;;  %v1839_v40 = vld [vmem:[%s2383_s9] ss:$0 sm:$0xff] }
  0x1f   : > { %v2094_v42 = vperm.slane %v790_v41, 0 }
  0x20   : > { %v757_v6 = vmul.f32 %v1858_v3, %v756_v5 }
  0x22   : > { %v758_v7 = vadd.f32 %v1858_v3, %v757_v6 }
  0x23   : > { %v968_v5 = vld [vmem:[%s2428_s29 + $0x18] sm:$0xff]  ;;  %v967_v6 = vld [vmem:[%s2428_s29 + $0x10] sm:$0xff] }
  0x24   : > { %v2053_v8 = vsel %vm759_vm1, %v1858_v3, %v758_v7  ;;  %v966_v7 = vld [vmem:[%s2428_s29 + $0x8] sm:$0xff] }
  0x8c   : > { %v753_v9 = vpop.xlane.xlu0 %752 }
  0x8d   : > { %v761_v10 = vmul.f32 %v2053_v8, %v753_v9  ;;  %v965_v9 = vld [vmem:[%s2428_s29] sm:$0xff] }
  0x8f   : > { %v762_v11 = vsub.f32 %v747_v0, %v761_v10 }
  0x91   : > { %v763_v12 = vmul.f32 %v762_v11, %v762_v11 }
  0x93   : > { %v764_v13 = vsel %vm750_vm0, %v763_v12, 0.0 }
  0x94   : > { %765 = vadd.xlane.f32.xlu0 %v764_v13 }
 0x107   : > { %v766_v18 = vpop.xlane.xlu0 %765 }
 0x108   : > { %v767_v19 = vmul.f32 %v766_v18, %v2053_v8 }
 0x10a   : > { %v768_v20 = vadd.f32 1e-12, %v767_v19 }
 0x10c   : > { %1859 = vrsqrt.f32 %v768_v20  ;;  %vm775_vm3 = vweird.f32 %v768_v20 }
 0x112   : > { %v1860_v21 = vpop.eup %1859 }
 0x113   : > { %v770_v22 = vmul.f32 %v1860_v21, %v768_v20  ;;  %vm776_vm2 = vweird.f32 %v1860_v21 }
 0x114   : > { %vm777_vm4 = vmor %vm775_vm3, %vm776_vm2 }
 0x115   : > { %v771_v23 = vmul.f32 %v1860_v21, %v770_v22 }
 0x117   : > { %v772_v24 = vmul.f32 0.5, %v771_v23 }
 0x119   : > { %v773_v25 = vsub.f32 1.5, %v772_v24  ;;  %v1032_v24 = vld [vmem:[%s2384_s10 + $0x18] sm:$0xff] }
 0x11b   : > { %v774_v26 = vmul.f32 %v1860_v21, %v773_v25  ;;  %v1031_v25 = vld [vmem:[%s2384_s10 + $0x10] sm:$0xff] }
 0x11d   : > { %v778_v28 = vsel %vm777_vm4, %v1860_v21, %v774_v26  ;;  %v1030_v26 = vld [vmem:[%s2384_s10 + $0x8] sm:$0xff] }
 0x11e   : > { %v779_v29 = vmul.f32 %v778_v28, %v762_v11 }
 0x120   : > { %v783_v31 = vmul.f32 %v1834_v27, %v779_v29  ;;  %v1029_v27 = vld [vmem:[%s2384_s10] sm:$0xff] }
 0x122   : > { %v2076_v32 = vadd.f32 %v1835_v30, %v783_v31 }
 0x124   : > { %1763 = vmatmul.msk.f32.vlgmr.msra.gmra.mxu0 %vm750_vm0, %v2076_v32 }
 0x1a1   : > { %v819_v34 = vpop.f32.mrf.mxu0 }
 0x1a2   : > { %v820_v35 = vadd.f32 %v1836_v33, %v819_v34 }
 0x1a4   : > { %893 = vrot.lane.b32.xlu2 %v820_v35, %s2407_s1  ;;  %823 = vrot.lane.b32.xlu1 %v820_v35, %s2410_s28  ;;  %s2431_s28 = smov 96   ;;  %s2432_s1 = smov 80  }
 0x1ac   : > { %895 = vrot.lane.b32.xlu1 %v820_v35, %s2409_s6  ;;  %s2430_s6 = sld [smem:[#allocation10_spill]] }
 0x1fe   : > { %v894_v38 = vpop.permute.xlu2 %893 }
 0x216   : > { %v824_v36 = vpop.permute.xlu1 %823 }
 0x217   : > { %1764 = vmatpush.xpose.msk.msra.mxu1 %vm825_vm5, %v824_v36 }
 0x21a   : > { %1765 = vmatmul.msk.f32.vlgmr.msra.gmra.mxu1 %vm825_vm5, %v820_v35 }
 0x21b   : > { %988 = vmatpush.msrb.mxu1 %v968_v5 }
 0x21d   : > { %989 = vmatpush.msrb.mxu1 %v967_v6 }
 0x21e   : > { %v896_v37 = vpop.permute.xlu1 %895 }
 0x21f   : > { %1767 = vmatpush.xpose.msk.msra.mxu3 %vm825_vm5, %v896_v37  ;;  %990 = vmatpush.msrb.mxu1 %v966_v7  ;;  %v1838_v37 = vld [vmem:[%s2430_s6] ss:$0 sm:$0xff] }
 0x221   : > { %991 = vmatpush.msrb.mxu1 %v965_v9 }
 0x222   : > { %1768 = vmatmul.msk.f32.vlgmr.msra.gmra.mxu3 %vm825_vm5, %v894_v38 }
 0x223   : > { %1052 = vmatpush.msrb.mxu3 %v1032_v24 }
 0x225   : > { %1053 = vmatpush.msrb.mxu3 %v1031_v25 }
 0x227   : > { %1054 = vmatpush.msrb.mxu3 %v1030_v26 }
 0x229   : > { %1055 = vmatpush.msrb.mxu3 %v1029_v27 }
 0x297   : > { %v847_v43 = vpop.f32.mrf.mxu1 }
 0x298   : > { %v850_v44 = vmul.f32 0.25, %v847_v43 }
 0x29a   : > { %v854_v45 = vadd.f32 %v2094_v42, %v850_v44  ;;  %v1840_v44 = vld [vmem:[%s2385_s11] ss:$0 sm:$0xff] }
 0x29c   : > { %v856_v46 = vsel %vm855_vm6, %v854_v45, -inf }
 0x29d   : > { %857 = vmax.xlane.f32.xlu2 %v856_v46 }
 0x2a5   : > { %v918_v47 = vpop.f32.mrf.mxu3 }
 0x2a6   : > { %v921_v48 = vmul.f32 0.25, %v918_v47 }
 0x2a8   : > { %v922_v49 = vadd.f32 %v921_v48, %v2094_v42 }
 0x2aa   : > { %v923_v50 = vsel %vm855_vm6, %v922_v49, -inf }
 0x2ab   : > { %924 = vmax.xlane.f32.xlu0 %v923_v50  ;;  %v1111_v50 = vld [vmem:[%s2386_s12 + $0x38] sm:$0xff] }
 0x2ac   : > { %1128 = vmatpush.msrb.mxu0 %v1111_v50 }
 0x2b5   : > { %934 = vrot.lane.b32.xlu2 %v820_v35, %s2406_s3  ;;  %s2433_s3 = smov 112  }
 0x310   : > { %v858_v51 = vpop.xlane.xlu2 %857 }
 0x311   : > { %v859_v52 = vsub.f32 %v854_v45, %v858_v51 }
 0x313   : > { %v860_v53 = vmul.f32 1.442695, %v859_v52 }
 0x315   : > { %1861 = vpow2.f32 %v860_v53  ;;  %v1110_v53 = vld [vmem:[%s2386_s12 + $0x30] sm:$0xff] }
 0x316   : > { %1129 = vmatpush.msrb.mxu0 %v1110_v53 }
 0x318   : > { %v935_v2 = vpop.permute.xlu2 %934 }
 0x31b   : > { %v1862_v54 = vpop.eup %1861 }
 0x31c   : > { %v862_v55 = vsel %vm855_vm6, %v1862_v54, 0.0 }
 0x31d   : > { %863 = vadd.xlane.f32.xlu1 %v862_v55 }
 0x31e   : > { %v925_v56 = vpop.xlane.xlu0 %924 }
 0x31f   : > { %v926_v57 = vsub.f32 %v922_v49, %v925_v56  ;;  %v1109_v56 = vld [vmem:[%s2386_s12 + $0x28] sm:$0xff] }
 0x320   : > { %1130 = vmatpush.msrb.mxu0 %v1109_v56 }
 0x321   : > { %v927_v58 = vmul.f32 1.442695, %v926_v57 }
 0x323   : > { %1863 = vpow2.f32 %v927_v58 }
 0x329   : > { %v1864_v59 = vpop.eup %1863 }
 0x32a   : > { %v929_v60 = vsel %vm855_vm6, %v1864_v59, 0.0 }
 0x32b   : > { %930 = vadd.xlane.f32.xlu0 %v929_v60 }
 0x33f   : > { %867 = vrot.lane.b32.xlu0 %v820_v35, %s2405_s25  ;;  %s2429_s25 = sld [smem:[#allocation9_spill]] }
 0x345   : > { %v1837_v14 = vld [vmem:[%s2429_s25] ss:$0 sm:$0xff] }
 0x390   : > { %v864_v61 = vpop.xlane.xlu1 %863 }
 0x391   : > { %1865 = vrcp.f32 %v864_v61  ;;  %v1107_v61 = vld [vmem:[%s2386_s12 + $0x18] sm:$0xff] }
 0x397   : > { %v1866_v63 = vpop.eup %1865 }
 0x398   : > { %v866_v1 = vmul.f32 %v1866_v63, %v1862_v54 }
 0x39e   : > { %v931_v62 = vpop.xlane.xlu0 %930 }
 0x39f   : > { %1867 = vrcp.f32 %v931_v62 }
 0x3a5   : > { %v1868_v3 = vpop.eup %1867 }
 0x3a6   : > { %v933_v4 = vmul.f32 %v1868_v3, %v1864_v59  ;;  %v1108_v59 = vld [vmem:[%s2386_s12 + $0x20] sm:$0xff] }
 0x3a7   : > { %1131 = vmatpush.msrb.mxu0 %v1108_v59 }
 0x3a9   : > { %1132 = vmatpush.msrb.mxu0 %v1107_v61  ;;  %v1844_v61 = vld [vmem:[%s2426_s4 + $0x1] ss:$0 sm:$0xff] }
 0x3b1   : > { %v868_v0 = vpop.permute.xlu0 %867 }
 0x3b2   : > { %888 = vmatpush.msra.mxu2 %v868_v0  ;;  %v1106_v0 = vld [vmem:[%s2386_s12 + $0x10] sm:$0xff] }
 0x3b3   : > { %1766 = vmatmul.msk.f32.vlgmr.msra.gmra.mxu2 %vm855_vm6, %v866_v1  ;;  %1133 = vmatpush.msrb.mxu0 %v1106_v0 }
 0x3b4   : > { %955 = vmatpush.msrb.mxu2 %v935_v2  ;;  %v1105_v2 = vld [vmem:[%s2386_s12 + $0x8] sm:$0xff] }
 0x3b5   : > { %1134 = vmatpush.msrb.mxu0 %v1105_v2 }
 0x3bb   : > { %1769 = vmatmul.msk.f32.vlgmr.msrb.gmra.mxu2 %vm855_vm6, %v933_v4  ;;  %v1104_v4 = vld [vmem:[%s2386_s12] sm:$0xff] }
 0x3bc   : > { %1135 = vmatpush.msrb.mxu0 %v1104_v4 }
 0x436   : > { %v890_v10 = vpop.f32.mrf.mxu2 }
 0x43e   : > { %v957_v11 = vpop.f32.mrf.mxu2 }
 0x43f   : > { %961 = vrot.lane.b32.xlu0 %v957_v11, %s2408_s8  ;;  %s2434_s8 = smov 48  }
 0x4b1   : > { %v962_v12 = vpop.permute.xlu0 %961 }
 0x4b2   : > { %v964_v13 = vsel %vm825_vm5, %v890_v10, %v962_v12 }
 0x4b3   : > { %1770 = vmatmul.msk.f32.vlgmr.msrb.gmra.mxu1 %vm750_vm0, %v964_v13 }
 0x530   : > { %v993_v15 = vpop.f32.mrf.mxu1 }
 0x531   : > { %v994_v16 = vadd.f32 %v1837_v14, %v993_v15 }
 0x533   : > { %v996_v17 = vadd.f32 %v994_v16, %v2076_v32 }
 0x535   : > { %v999_v18 = vsel %vm750_vm0, %v996_v17, 0.0 }
 0x536   : > { %1000 = vadd.xlane.f32.xlu1 %v999_v18 }
 0x5a9   : > { %v1001_v19 = vpop.xlane.xlu1 %1000 }
 0x5aa   : > { %v1002_v20 = vmul.f32 %v1001_v19, %v2053_v8 }
 0x5ac   : > { %v1003_v21 = vsub.f32 %v996_v17, %v1002_v20 }
 0x5ae   : > { %v1004_v22 = vmul.f32 %v1003_v21, %v1003_v21 }
 0x5b0   : > { %v1005_v23 = vsel %vm750_vm0, %v1004_v22, 0.0 }
 0x5b1   : > { %1006 = vadd.xlane.f32.xlu0 %v1005_v23 }
 0x624   : > { %v1007_v28 = vpop.xlane.xlu0 %1006 }
 0x625   : > { %v1008_v29 = vmul.f32 %v1007_v28, %v2053_v8 }
 0x627   : > { %v1009_v30 = vadd.f32 1e-12, %v1008_v29 }
 0x629   : > { %1869 = vrsqrt.f32 %v1009_v30  ;;  %vm1016_vm8 = vweird.f32 %v1009_v30 }
 0x62f   : > { %v1870_v31 = vpop.eup %1869 }
 0x630   : > { %v1011_v32 = vmul.f32 %v1870_v31, %v1009_v30  ;;  %vm1017_vm7 = vweird.f32 %v1870_v31 }
 0x631   : > { %vm1018_vm9 = vmor %vm1016_vm8, %vm1017_vm7 }
 0x632   : > { %v1012_v33 = vmul.f32 %v1870_v31, %v1011_v32 }
 0x634   : > { %v1013_v34 = vmul.f32 0.5, %v1012_v33 }
 0x636   : > { %v1014_v35 = vsub.f32 1.5, %v1013_v34 }
 0x638   : > { %v1015_v36 = vmul.f32 %v1870_v31, %v1014_v35 }
 0x63a   : > { %v1019_v38 = vsel %vm1018_vm9, %v1870_v31, %v1015_v36  ;;  %v1841_v31 = vld [vmem:[%s2387_s13] ss:$0 sm:$0xff] }
 0x63b   : > { %v1020_v39 = vmul.f32 %v1019_v38, %v1003_v21 }
 0x63d   : > { %v1024_v41 = vmul.f32 %v1838_v37, %v1020_v39 }
 0x63f   : > { %v2147_v43 = vadd.f32 %v1839_v40, %v1024_v41  ;;  %v1777_v41 = vld [vmem:[%s2423_s30 + $0x38] sm:$0xff] }
 0x640   : > { %1198 = vmatpush.msra.mxu2 %v1777_v41 }
 0x641   : > { %1771 = vmatmul.msk.f32.vlgmr.msrb.gmra.mxu3 %vm750_vm0, %v2147_v43 }
 0x6c4   : > { %v1057_v45 = vpop.f32.mrf.mxu3 }
 0x6c5   : > { %v1058_v46 = vadd.f32 %v1840_v44, %v1057_v45  ;;  %v1775_v44 = vld [vmem:[%s2423_s30 + $0x28] sm:$0xff]  ;;  %v1774_v45 = vld [vmem:[%s2423_s30 + $0x20] sm:$0xff] }
 0x6c7   : > { %v1061_v47 = vmul.f32 0.70710677, %v1058_v46  ;;  %v1060_v28 = vmul.f32 0.5, %v1058_v46 }
 0x6c9   : > { %v1062_v48 = vmul.f32 %v1061_v47, %v1061_v47 }
 0x6cb   : > { %v1063_v49 = vmin.f32 %v1062_v48, 16.0 }
 0x6cd   : > { %v1064_v51 = vmul.f32 2.1237322e-06, %v1063_v49  ;;  %v1075_v52 = vmul.f32 3.8918573e-05, %v1063_v49 }
 0x6cf   : > { %v1065_v54 = vadd.f32 0.00028619796, %v1064_v51  ;;  %v1076_v55 = vadd.f32 0.001143296, %v1075_v52 }
 0x6d1   : > { %v1066_v57 = vmul.f32 %v1065_v54, %v1063_v49  ;;  %v1077_v58 = vmul.f32 %v1076_v55, %v1063_v49  ;;  %v1842_v55 = vld [vmem:[%s2388_s14] ss:$0 sm:$0xff] }
 0x6d3   : > { %v1078_v60 = vadd.f32 0.014752088, %v1077_v58  ;;  %v1067_v62 = vadd.f32 0.0036580483, %v1066_v57  ;;  %v1843_v58 = vld [vmem:[%s2389_s15] ss:$0 sm:$0xff] }
 0x6d5   : > { %v1079_v63 = vmul.f32 %v1078_v60, %v1063_v49  ;;  %v1068_v3 = vmul.f32 %v1067_v62, %v1063_v49 }
 0x6d7   : > { %v1080_v1 = vadd.f32 0.112945676, %v1079_v63  ;;  %v1069_v7 = vadd.f32 0.05243302, %v1068_v3 }
 0x6d9   : > { %v1081_v5 = vmul.f32 %v1080_v1, %v1063_v49  ;;  %v1070_v11 = vmul.f32 %v1069_v7, %v1063_v49 }
 0x6db   : > { %v1082_v6 = vadd.f32 0.4994258, %v1081_v5  ;;  %v1071_v12 = vadd.f32 0.18741608, %v1070_v11 }
 0x6dd   : > { %v1083_v9 = vmul.f32 %v1082_v6, %v1063_v49  ;;  %v1072_v14 = vmul.f32 %v1071_v12, %v1063_v49 }
 0x6df   : > { %v1084_v10 = vadd.f32 1.0, %v1083_v9  ;;  %v1073_v18 = vadd.f32 1.1283791, %v1072_v14 }
 0x6e1   : > { %1871 = vrcp.f32 %v1084_v10  ;;  %v1096_v17 = vand.u32 2147483648, %v1084_v10  ;;  %v1094_v20 = vand.u32 2147483647, %v1084_v10  ;;  %vm1090_vm11 = vweird.f32 %v1084_v10 }
 0x6e2   : > { %v1074_v23 = vmul.f32 %v1073_v18, %v1061_v47 }
 0x6e3   : > { %v1097_v22 = vor.u32 1.1754944e-38, %v1096_v17  ;;  %vm1095_vm13 = vcmp.eq.f32.partialorder %v1094_v20, 8.507059e+37 }
 0x6e7   : > { %v1872_v13 = vpop.eup %1871 }
 0x6e8   : > { %v1086_v15 = vmul.f32 %v1872_v13, %v1084_v10  ;;  %vm1091_vm10 = vweird.f32 %v1872_v13 }
 0x6e9   : > { %vm1092_vm12 = vmor %vm1090_vm11, %vm1091_vm10 }
 0x6ea   : > { %v1087_v16 = vsub.f32 1.0, %v1086_v15 }
 0x6ec   : > { %v1088_v19 = vmul.f32 %v1872_v13, %v1087_v16 }
 0x6ee   : > { %v1089_v21 = vadd.f32 %v1872_v13, %v1088_v19 }
 0x6f0   : > { %v1093_v24 = vsel %vm1092_vm12, %v1872_v13, %v1089_v21 }
 0x6f1   : > { %v1098_v25 = vsel %vm1095_vm13, %v1097_v22, %v1093_v24 }
 0x6f2   : > { %v1099_v26 = vmul.f32 %v1098_v25, %v1074_v23 }
 0x6f4   : > { %v1772_v27 = vclamps-f32 %v1099_v26, 1.0 }
 0x6f6   : > { %v1102_v29 = vadd.f32 1.0, %v1772_v27 }
 0x6f8   : > { %v1103_v30 = vmul.f32 %v1102_v29, %v1060_v28  ;;  %v1789_v29 = vld [vmem:[%s2428_s29 + $0x38] sm:$0xff] }
 0x6fa   : > { %1773 = vmatmul.msk.f32.vlgmr.msrb.gmra.mxu0 %vm1116_vm14, %v1103_v30  ;;  %v1788_v30 = vld [vmem:[%s2428_s29 + $0x30] sm:$0xff] }
 0x777   : > { %v1137_v32 = vpop.f32.mrf.mxu0 }
 0x778   : > { %v1138_v33 = vadd.f32 %v1841_v31, %v1137_v32  ;;  %v1787_v31 = vld [vmem:[%s2428_s29 + $0x28] sm:$0xff] }
 0x77a   : > { %v1140_v34 = vadd.f32 %v1138_v33, %v2147_v43  ;;  %v1776_v43 = vld [vmem:[%s2423_s30 + $0x30] sm:$0xff]  ;;  %v1786_v33 = vld [vmem:[%s2428_s29 + $0x20] sm:$0xff] }
 0x77b   : > { %1199 = vmatpush.msra.mxu2 %v1776_v43 }
 0x77c   : > { %v1143_v35 = vsel %vm750_vm0, %v1140_v34, 0.0 }
 0x77d   : > { %1144 = vadd.xlane.f32.xlu1 %v1143_v35  ;;  %1200 = vmatpush.msra.mxu2 %v1775_v44 }
 0x77f   : > { %1201 = vmatpush.msra.mxu2 %v1774_v45 }
 0x7f0   : > { %v1145_v36 = vpop.xlane.xlu1 %1144 }
 0x7f1   : > { %v1146_v37 = vmul.f32 %v1145_v36, %v2053_v8 }
 0x7f3   : > { %v1147_v38 = vsub.f32 %v1140_v34, %v1146_v37  ;;  %v1845_v37 = vld [vmem:[%s2429_s25 + $0x1] ss:$0 sm:$0xff] }
 0x7f5   : > { %v1148_v39 = vmul.f32 %v1147_v38, %v1147_v38 }
 0x7f7   : > { %v1149_v40 = vsel %vm750_vm0, %v1148_v39, 0.0 }
 0x7f8   : > { %1150 = vadd.xlane.f32.xlu2 %v1149_v40 }
 0x86b   : > { %v1151_v46 = vpop.xlane.xlu2 %1150 }
 0x86c   : > { %v1152_v47 = vmul.f32 %v1151_v46, %v2053_v8 }
 0x86e   : > { %v1153_v48 = vadd.f32 1e-12, %v1152_v47 }
 0x870   : > { %1873 = vrsqrt.f32 %v1153_v48  ;;  %vm1160_vm1 = vweird.f32 %v1153_v48 }
 0x876   : > { %v1874_v49 = vpop.eup %1873 }
 0x877   : > { %v1155_v50 = vmul.f32 %v1874_v49, %v1153_v48  ;;  %vm1161_vm15 = vweird.f32 %v1874_v49  ;;  %v1797_v48 = vld [vmem:[%s2384_s10 + $0x38] sm:$0xff] }
 0x878   : > { %vm1162_vm2 = vmor %vm1160_vm1, %vm1161_vm15  ;;  %1437 = vmatpush.msra.mxu0 %v1797_v48 }
 0x879   : > { %v1156_v51 = vmul.f32 %v1874_v49, %v1155_v50  ;;  %v1795_v50 = vld [vmem:[%s2384_s10 + $0x28] sm:$0xff] }
 0x87b   : > { %v1157_v52 = vmul.f32 0.5, %v1156_v51  ;;  %v1794_v51 = vld [vmem:[%s2384_s10 + $0x20] sm:$0xff] }
 0x87d   : > { %v1158_v53 = vsub.f32 1.5, %v1157_v52 }
 0x87f   : > { %v1159_v54 = vmul.f32 %v1874_v49, %v1158_v53 }
 0x881   : > { %v1163_v56 = vsel %vm1162_vm2, %v1874_v49, %v1159_v54  ;;  %v1796_v49 = vld [vmem:[%s2384_s10 + $0x30] sm:$0xff] }
 0x882   : > { %v1164_v57 = vmul.f32 %v1163_v56, %v1147_v38  ;;  %1438 = vmatpush.msra.mxu0 %v1796_v49 }
 0x884   : > { %v1168_v59 = vmul.f32 %v1842_v55, %v1164_v57  ;;  %1439 = vmatpush.msra.mxu0 %v1795_v50 }
 0x886   : > { %v2205_v60 = vadd.f32 %v1843_v58, %v1168_v59  ;;  %1440 = vmatpush.msra.mxu0 %v1794_v51 }
 0x888   : > { %1779 = vmatmul.msk.f32.vlgmr.msra.gmra.mxu2 %vm750_vm0, %v2205_v60 }
 0x90b   : > { %v1203_v62 = vpop.f32.mrf.mxu2 }
 0x90c   : > { %v1204_v63 = vadd.f32 %v1844_v61, %v1203_v62  ;;  %v1846_v61 = vld [vmem:[%s2430_s6 + $0x1] ss:$0 sm:$0xff]  ;;  %s2437_s6 = sshll.u32 %s2439_s26, 3 }
 0x90e   : > { %1207 = vrot.lane.b32.xlu0 %v1204_v63, %s2431_s28  ;;  %1274 = vrot.lane.b32.xlu1 %v1204_v63, %s2432_s1  ;;  %s746_s1 = scalar_lea.vmem %s2398_s24, %s2437_s6 }
 0x916   : > { %1272 = vrot.lane.b32.xlu1 %v1204_v63, %s2433_s3 }
 0x980   : > { %v1208_v0 = vpop.permute.xlu0 %1207  ;;  %v1275_v1 = vpop.permute.xlu1 %1274 }
 0x981   : > { %1780 = vmatpush.xpose.msk.msra.mxu1 %vm825_vm5, %v1208_v0  ;;  %1783 = vmatpush.xpose.msk.msrb.mxu2 %vm825_vm5, %v1275_v1  ;;  %v1847_v0 = vld [vmem:[%s2383_s9 + $0x1] ss:$0 sm:$0xff] }
 0x984   : > { %1781 = vmatmul.msk.f32.vlgmr.msra.gmra.mxu1 %vm825_vm5, %v1204_v63 }
 0x988   : > { %v1273_v2 = vpop.permute.xlu1 %1272 }
 0x989   : > { %1784 = vmatmul.msk.f32.vlgmr.msrb.gmra.mxu2 %vm825_vm5, %v1273_v2 }
 0xa01   : > { %v1230_v3 = vpop.f32.mrf.mxu1 }
 0xa02   : > { %v1233_v4 = vmul.f32 0.25, %v1230_v3  ;;  %v1848_v3 = vld [vmem:[%s2385_s11 + $0x1] ss:$0 sm:$0xff] }
 0xa04   : > { %v1234_v5 = vadd.f32 %v1233_v4, %v2094_v42 }
 0xa06   : > { %v1235_v6 = vsel %vm855_vm6, %v1234_v5, -inf }
 0xa07   : > { %1236 = vmax.xlane.f32.xlu2 %v1235_v6 }
 0xa0c   : > { %v1297_v7 = vpop.f32.mrf.mxu2 }
 0xa0d   : > { %v1300_v9 = vmul.f32 0.25, %v1297_v7 }
 0xa0f   : > { %v1301_v10 = vadd.f32 %v1300_v9, %v2094_v42 }
 0xa11   : > { %v1302_v11 = vsel %vm855_vm6, %v1301_v10, -inf }
 0xa12   : > { %1303 = vmax.xlane.f32.xlu1 %v1302_v11 }
 0xa1f   : > { %1313 = vrot.lane.b32.xlu2 %v1204_v63, %s2434_s8  ;;  %s2436_s8 = smov 16  }
 0xa2b   : > { %1246 = vrot.lane.b32.xlu1 %v1204_v63, %s2435_s0 }
 0xa7a   : > { %v1237_v12 = vpop.xlane.xlu2 %1236 }
 0xa7b   : > { %v1238_v13 = vsub.f32 %v1234_v5, %v1237_v12 }
 0xa7d   : > { %v1239_v14 = vmul.f32 1.442695, %v1238_v13  ;;  %v1807_v13 = vld [vmem:[%s2386_s12 + $0x70] sm:$0xff] }
 0xa7f   : > { %1875 = vpow2.f32 %v1239_v14 }
 0xa82   : > { %v1314_v15 = vpop.permute.xlu2 %1313 }
 0xa83   : > { %1334 = vmatpush.msrb.mxu1 %v1314_v15 }
 0xa85   : > { %v1876_v16 = vpop.eup %1875  ;;  %v1304_v17 = vpop.xlane.xlu1 %1303 }
 0xa86   : > { %v1305_v18 = vsub.f32 %v1301_v10, %v1304_v17  ;;  %v1241_v19 = vsel %vm855_vm6, %v1876_v16, 0.0  ;;  %v1808_v10 = vld [vmem:[%s2386_s12 + $0x78] sm:$0xff] }
 0xa87   : > { %1242 = vadd.xlane.f32.xlu2 %v1241_v19  ;;  %1514 = vmatpush.msra.mxu2 %v1808_v10  ;;  %v1805_v19 = vld [vmem:[%s2386_s12 + $0x60] sm:$0xff] }
 0xa88   : > { %v1306_v42 = vmul.f32 1.442695, %v1305_v18 }
 0xa89   : > { %1515 = vmatpush.msra.mxu2 %v1807_v13 }
 0xa8a   : > { %1877 = vpow2.f32 %v1306_v42 }
 0xa90   : > { %v1878_v20 = vpop.eup %1877 }
 0xa91   : > { %v1308_v21 = vsel %vm855_vm6, %v1878_v20, 0.0 }
 0xa92   : > { %1309 = vadd.xlane.f32.xlu0 %v1308_v21 }
 0xa9d   : > { %v1247_v22 = vpop.permute.xlu1 %1246 }
 0xa9e   : > { %1267 = vmatpush.msra.mxu3 %v1247_v22 }
 0xaa0   : > { %1369 = vmatpush.msrb.mxu3 %v1789_v29 }
 0xaa2   : > { %1370 = vmatpush.msrb.mxu3 %v1788_v30 }
 0xaa4   : > { %1371 = vmatpush.msrb.mxu3 %v1787_v31 }
 0xaa6   : > { %1372 = vmatpush.msrb.mxu3 %v1786_v33 }
 0xafa   : > { %v1243_v23 = vpop.xlane.xlu2 %1242 }
 0xafb   : > { %1879 = vrcp.f32 %v1243_v23  ;;  %v1803_v23 = vld [vmem:[%s2386_s12 + $0x50] sm:$0xff] }
 0xb01   : > { %v1880_v24 = vpop.eup %1879 }
 0xb02   : > { %v1245_v25 = vmul.f32 %v1880_v24, %v1876_v16  ;;  %v1806_v16 = vld [vmem:[%s2386_s12 + $0x68] sm:$0xff] }
 0xb03   : > { %1516 = vmatpush.msra.mxu2 %v1806_v16 }
 0xb04   : > { %1782 = vmatmul.msk.f32.vlgmr.msra.gmra.mxu3 %vm855_vm6, %v1245_v25  ;;  %v1802_v25 = vld [vmem:[%s2386_s12 + $0x48] sm:$0xff] }
 0xb05   : > { %v1310_v26 = vpop.xlane.xlu0 %1309  ;;  %1517 = vmatpush.msra.mxu2 %v1805_v19  ;;  %v1596_v19 = vld [vmem:[%s2392_s18 + $0x18] sm:$0xff] }
 0xb06   : > { %1881 = vrcp.f32 %v1310_v26  ;;  %1616 = vmatpush.msra.mxu3 %v1596_v19 }
 0xb0c   : > { %v1882_v27 = vpop.eup %1881 }
 0xb0d   : > { %v1312_v28 = vmul.f32 %v1882_v27, %v1878_v20  ;;  %v1804_v20 = vld [vmem:[%s2386_s12 + $0x58] sm:$0xff]  ;;  %v1801_v27 = vld [vmem:[%s2386_s12 + $0x40] sm:$0xff] }
 0xb0e   : > { %1518 = vmatpush.msra.mxu2 %v1804_v20  ;;  %v1594_v20 = vld [vmem:[%s2392_s18 + $0x8] sm:$0xff] }
 0xb0f   : > { %1785 = vmatmul.msk.f32.vlgmr.msrb.gmra.mxu1 %vm855_vm6, %v1312_v28 }
 0xb10   : > { %1519 = vmatpush.msra.mxu2 %v1803_v23 }
 0xb12   : > { %1520 = vmatpush.msra.mxu2 %v1802_v25 }
 0xb14   : > { %1521 = vmatpush.msra.mxu2 %v1801_v27 }
 0xb87   : > { %v1269_v34 = vpop.f32.mrf.mxu3 }
 0xb8c   : > { %v1336_v32 = vpop.f32.mrf.mxu1 }
 0xb8d   : > { %1340 = vrot.lane.b32.xlu0 %v1336_v32, %s2436_s8 }
 0xbff   : > { %v1341_v35 = vpop.permute.xlu0 %1340 }
 0xc00   : > { %v1343_v36 = vsel %vm825_vm5, %v1269_v34, %v1341_v35 }
 0xc01   : > { %1791 = vmatmul.msk.f32.vlgmr.msrb.gmra.mxu3 %vm750_vm0, %v1343_v36 }
 0xc84   : > { %v1374_v38 = vpop.f32.mrf.mxu3 }
 0xc85   : > { %v1375_v39 = vadd.f32 %v1845_v37, %v1374_v38 }
 0xc87   : > { %v1377_v40 = vadd.f32 %v1375_v39, %v2205_v60 }
 0xc89   : > { %v1382_v41 = vsel %vm750_vm0, %v1377_v40, 0.0 }
 0xc8a   : > { %1383 = vadd.xlane.f32.xlu1 %v1382_v41 }
 0xcfd   : > { %v1384_v43 = vpop.xlane.xlu1 %1383 }
 0xcfe   : > { %v1385_v44 = vmul.f32 %v1384_v43, %v2053_v8 }
 0xd00   : > { %v1386_v45 = vsub.f32 %v1377_v40, %v1385_v44 }
 0xd02   : > { %v1387_v46 = vmul.f32 %v1386_v45, %v1386_v45 }
 0xd04   : > { %v1388_v47 = vsel %vm750_vm0, %v1387_v46, 0.0 }
 0xd05   : > { %1389 = vadd.xlane.f32.xlu0 %v1388_v47 }
 0xd78   : > { %v1390_v52 = vpop.xlane.xlu0 %1389 }
 0xd79   : > { %v1391_v53 = vmul.f32 %v1390_v52, %v2053_v8 }
 0xd7b   : > { %v1392_v54 = vadd.f32 1e-12, %v1391_v53 }
 0xd7d   : > { %1883 = vrsqrt.f32 %v1392_v54  ;;  %vm1399_vm4 = vweird.f32 %v1392_v54 }
 0xd83   : > { %v1884_v55 = vpop.eup %1883 }
 0xd84   : > { %v1394_v56 = vmul.f32 %v1884_v55, %v1392_v54  ;;  %vm1400_vm3 = vweird.f32 %v1884_v55  ;;  %v1849_v54 = vld [vmem:[%s2387_s13 + $0x1] ss:$0 sm:$0xff] }
 0xd85   : > { %vm1401_vm6 = vmor %vm1399_vm4, %vm1400_vm3 }
 0xd86   : > { %v1395_v57 = vmul.f32 %v1884_v55, %v1394_v56 }
 0xd88   : > { %v1396_v58 = vmul.f32 0.5, %v1395_v57 }
 0xd8a   : > { %v1397_v59 = vsub.f32 1.5, %v1396_v58 }
 0xd8c   : > { %v1398_v60 = vmul.f32 %v1884_v55, %v1397_v59 }
 0xd8e   : > { %v1402_v62 = vsel %vm1401_vm6, %v1884_v55, %v1398_v60 }
 0xd8f   : > { %v1403_v63 = vmul.f32 %v1402_v62, %v1386_v45 }
 0xd91   : > { %v1407_v1 = vmul.f32 %v1846_v61, %v1403_v63 }
 0xd93   : > { %v2270_v2 = vadd.f32 %v1847_v0, %v1407_v1  ;;  %v1564_v0 = vld [vmem:[%s2390_s16 + $0x18] sm:$0xff]  ;;  %v1563_v1 = vld [vmem:[%s2390_s16 + $0x10] sm:$0xff] }
 0xd94   : > { %1584 = vmatpush.msra.mxu1 %v1564_v0 }
 0xd95   : > { %1799 = vmatmul.msk.f32.vlgmr.msra.gmra.mxu0 %vm750_vm0, %v2270_v2 }
 0xd96   : > { %1585 = vmatpush.msra.mxu1 %v1563_v1 }
 0xe12   : > { %v1442_v4 = vpop.f32.mrf.mxu0 }
 0xe13   : > { %v1443_v5 = vadd.f32 %v1848_v3, %v1442_v4  ;;  %v1561_v3 = vld [vmem:[%s2390_s16] sm:$0xff] }
 0xe15   : > { %v1446_v6 = vmul.f32 0.70710677, %v1443_v5  ;;  %v1445_v51 = vmul.f32 0.5, %v1443_v5 }
 0xe17   : > { %v1447_v7 = vmul.f32 %v1446_v6, %v1446_v6 }
 0xe19   : > { %v1448_v9 = vmin.f32 %v1447_v7, 16.0 }
 0xe1b   : > { %v1449_v11 = vmul.f32 2.1237322e-06, %v1448_v9  ;;  %v1460_v12 = vmul.f32 3.8918573e-05, %v1448_v9 }
 0xe1d   : > { %v1450_v14 = vadd.f32 0.00028619796, %v1449_v11  ;;  %v1461_v15 = vadd.f32 0.001143296, %v1460_v12 }
 0xe1f   : > { %v1451_v17 = vmul.f32 %v1450_v14, %v1448_v9  ;;  %v1462_v18 = vmul.f32 %v1461_v15, %v1448_v9  ;;  %v1850_v14 = vld [vmem:[%s2388_s14 + $0x1] ss:$0 sm:$0xff] }
 0xe21   : > { %v1463_v42 = vadd.f32 0.014752088, %v1462_v18  ;;  %v1452_v21 = vadd.f32 0.0036580483, %v1451_v17 }
 0xe23   : > { %v1464_v22 = vmul.f32 %v1463_v42, %v1448_v9  ;;  %v1453_v26 = vmul.f32 %v1452_v21, %v1448_v9  ;;  %v1595_v42 = vld [vmem:[%s2392_s18 + $0x10] sm:$0xff]  ;;  %v1593_v21 = vld [vmem:[%s2392_s18] sm:$0xff] }
 0xe24   : > { %1617 = vmatpush.msra.mxu3 %v1595_v42 }
 0xe25   : > { %v1465_v24 = vadd.f32 0.112945676, %v1464_v22  ;;  %v1454_v30 = vadd.f32 0.05243302, %v1453_v26  ;;  %v1852_v22 = vld [vmem:[%s2391_s17] ss:$0 sm:$0xff] }
 0xe26   : > { %1618 = vmatpush.msra.mxu3 %v1594_v20  ;;  %v1853_v26 = vld [vmem:[%s2393_s19] ss:$0 sm:$0xff] }
 0xe27   : > { %v1466_v28 = vmul.f32 %v1465_v24, %v1448_v9  ;;  %v1455_v33 = vmul.f32 %v1454_v30, %v1448_v9 }
 0xe28   : > { %1619 = vmatpush.msra.mxu3 %v1593_v21 }
 0xe29   : > { %v1467_v29 = vadd.f32 0.4994258, %v1466_v28  ;;  %v1456_v34 = vadd.f32 0.18741608, %v1455_v33 }
 0xe2b   : > { %v1468_v31 = vmul.f32 %v1467_v29, %v1448_v9  ;;  %v1457_v36 = vmul.f32 %v1456_v34, %v1448_v9 }
 0xe2d   : > { %v1469_v32 = vadd.f32 1.0, %v1468_v31  ;;  %v1458_v40 = vadd.f32 1.1283791, %v1457_v36  ;;  %v1910_v31 = vmov 16.0  }
 0xe2f   : > { %1885 = vrcp.f32 %v1469_v32  ;;  %v1481_v39 = vand.u32 2147483648, %v1469_v32  ;;  %v1479_v43 = vand.u32 2147483647, %v1469_v32  ;;  %vm1475_vm8 = vweird.f32 %v1469_v32 }
 0xe30   : > { %v1459_v46 = vmul.f32 %v1458_v40, %v1446_v6 }
 0xe31   : > { %v1482_v45 = vor.u32 1.1754944e-38, %v1481_v39  ;;  %vm1480_vm10 = vcmp.eq.f32.partialorder %v1479_v43, 8.507059e+37 }
 0xe35   : > { %v1886_v35 = vpop.eup %1885 }
 0xe36   : > { %v1471_v37 = vmul.f32 %v1886_v35, %v1469_v32  ;;  %vm1476_vm7 = vweird.f32 %v1886_v35 }
 0xe37   : > { %vm1477_vm9 = vmor %vm1475_vm8, %vm1476_vm7 }
 0xe38   : > { %v1472_v38 = vsub.f32 1.0, %v1471_v37 }
 0xe3a   : > { %v1473_v41 = vmul.f32 %v1886_v35, %v1472_v38 }
 0xe3c   : > { %v1474_v44 = vadd.f32 %v1886_v35, %v1473_v41 }
 0xe3e   : > { %v1478_v47 = vsel %vm1477_vm9, %v1886_v35, %v1474_v44  ;;  %v1665_v44 = vld [vmem:[%s2396_s22 + $0x8] sm:$0xff] }
 0xe3f   : > { %v1483_v48 = vsel %vm1480_vm10, %v1482_v45, %v1478_v47  ;;  %v1664_v45 = vld [vmem:[%s2396_s22] sm:$0xff]  ;;  %1687 = vmatpush.msrb.mxu0 %v1665_v44 }
 0xe40   : > { %v1484_v49 = vmul.f32 %v1483_v48, %v1459_v46 }
 0xe41   : > { %1688 = vmatpush.msrb.mxu0 %v1664_v45 }
 0xe42   : > { %v1800_v50 = vclamps-f32 %v1484_v49, 1.0 }
 0xe44   : > { %v1487_v52 = vadd.f32 1.0, %v1800_v50 }
 0xe46   : > { %v1488_v53 = vmul.f32 %v1487_v52, %v1445_v51 }
 0xe48   : > { %1810 = vmatmul.msk.f32.vlgmr.msra.gmra.mxu2 %vm1116_vm14, %v1488_v53 }
 0xecb   : > { %v1523_v55 = vpop.f32.mrf.mxu2 }
 0xecc   : > { %v1524_v56 = vadd.f32 %v1849_v54, %v1523_v55  ;;  %v1854_v55 = vld [vmem:[%s2394_s20] ss:$0 sm:$0xff] }
 0xece   : > { %v1526_v57 = vadd.f32 %v1524_v56, %v2270_v2  ;;  %v1562_v2 = vld [vmem:[%s2390_s16 + $0x8] sm:$0xff] }
 0xecf   : > { %1586 = vmatpush.msra.mxu1 %v1562_v2 }
 0xed0   : > { %v1531_v58 = vsel %vm750_vm0, %v1526_v57, 0.0 }
 0xed1   : > { %1532 = vadd.xlane.f32.xlu2 %v1531_v58  ;;  %1587 = vmatpush.msra.mxu1 %v1561_v3  ;;  %v1855_v58 = vld [vmem:[%s2395_s21] ss:$0 sm:$0xff] }
 0xf44   : > { %v1533_v59 = vpop.xlane.xlu2 %1532 }
 0xf45   : > { %v1534_v60 = vmul.f32 %v1533_v59, %v2053_v8 }
 0xf47   : > { %v1535_v61 = vsub.f32 %v1526_v57, %v1534_v60 }
 0xf49   : > { %v1536_v62 = vmul.f32 %v1535_v61, %v1535_v61 }
 0xf4b   : > { %v1537_v63 = vsel %vm750_vm0, %v1536_v62, 0.0 }
 0xf4c   : > { %1538 = vadd.xlane.f32.xlu2 %v1537_v63 }
 0xfbf   : > { %v1539_v4 = vpop.xlane.xlu2 %1538 }
 0xfc0   : > { %v1540_v5 = vmul.f32 %v1539_v4, %v2053_v8  ;;  %v1851_v8 = vld [vmem:[%s2389_s15 + $0x1] ss:$0 sm:$0xff] }
 0xfc2   : > { %v1541_v6 = vadd.f32 1e-12, %v1540_v5 }
 0xfc4   : > { %1887 = vrsqrt.f32 %v1541_v6  ;;  %vm1548_vm12 = vweird.f32 %v1541_v6 }
 0xfca   : > { %v1888_v7 = vpop.eup %1887 }
 0xfcb   : > { %v1543_v9 = vmul.f32 %v1888_v7, %v1541_v6  ;;  %vm1549_vm11 = vweird.f32 %v1888_v7 }
 0xfcc   : > { %vm1550_vm13 = vmor %vm1548_vm12, %vm1549_vm11 }
 0xfcd   : > { %v1544_v10 = vmul.f32 %v1888_v7, %v1543_v9 }
 0xfcf   : > { %v1545_v11 = vmul.f32 0.5, %v1544_v10 }
 0xfd1   : > { %v1546_v12 = vsub.f32 1.5, %v1545_v11 }
 0xfd3   : > { %v1547_v13 = vmul.f32 %v1888_v7, %v1546_v12 }
 0xfd5   : > { %v1551_v15 = vsel %vm1550_vm13, %v1888_v7, %v1547_v13 }
 0xfd6   : > { %v1552_v16 = vmul.f32 %v1551_v15, %v1535_v61  ;;  %v1856_v61 = vld [vmem:[%s2397_s23] ss:$0 sm:$0xff] }
 0xfd8   : > { %v1556_v17 = vmul.f32 %v1850_v14, %v1552_v16 }
 0xfda   : > { %v1560_v18 = vadd.f32 %v1851_v8, %v1556_v17 }
 0xfdc   : > { %1813 = vmatmul.msk.f32.vlgmr.msra.gmra.mxu1 %vm750_vm0, %v1560_v18 }
0x1059   : > { %v1589_v23 = vpop.f32.mrf.mxu1 }
0x105a   : > { %v1590_v24 = vadd.f32 %v1852_v22, %v1589_v23 }
0x105c   : > { %1889 = vtanh.f32 %v1590_v24 }
0x105d   : > { %1891 = vrcp.f32 %v1910_v31 }
0x1062   : > { %v1890_v25 = vpop.eup %1889 }
0x1063   : > { %1814 = vmatmul.msk.f32.vlgmr.msra.gmra.mxu3 %vm750_vm0, %v1890_v25  ;;  %v1892_v32 = vpop.eup %1891 }
0x1064   : > { %v1631_v33 = vmul.f32 16.0, %v1892_v32  ;;  %vm1635_vm14 = vweird.f32 %v1892_v32 }
0x1066   : > { %v1632_v34 = vsub.f32 1.0, %v1631_v33 }
0x1068   : > { %v1633_v35 = vmul.f32 %v1892_v32, %v1632_v34 }
0x106a   : > { %v1634_v36 = vadd.f32 %v1892_v32, %v1633_v35 }
0x106c   : > { %v1636_v37 = vsel %vm1635_vm14, %v1892_v32, %v1634_v36 }
0x10e6   : > { %v1621_v27 = vpop.f32.mrf.mxu3 }
0x10e7   : > { %v1622_v28 = vadd.f32 %v1853_v26, %v1621_v27 }
0x10e9   : > { %v1624_v29 = vmax.f32 %v1622_v28, 0.0 }
0x10eb   : > { %v1627_v30 = vsel %vm825_vm5, %v1624_v29, 0.0 }
0x10ec   : > { %1628 = vadd.xlane.f32.xlu2 %v1627_v30 }
0x115f   : > { %v1629_v38 = vpop.xlane.xlu2 %1628 }
0x1160   : > { %v1637_v39 = vmul.f32 %v1636_v37, %v1629_v38 }
0x1162   : > { %v1638_v40 = vsub.f32 %v1624_v29, %v1637_v39 }
0x1164   : > { %v1639_v41 = vmul.f32 %v1638_v40, %v1638_v40 }
0x1166   : > { %v1640_v43 = vsel %vm825_vm5, %v1639_v41, 0.0 }
0x1167   : > { %1641 = vadd.xlane.f32.xlu2 %v1640_v43 }
0x11da   : > { %v1642_v46 = vpop.xlane.xlu2 %1641 }
0x11db   : > { %v1643_v47 = vmul.f32 %v1642_v46, %v1636_v37 }
0x11dd   : > { %v1644_v48 = vadd.f32 1e-05, %v1643_v47 }
0x11df   : > { %1893 = vrsqrt.f32 %v1644_v48  ;;  %vm1651_vm15 = vweird.f32 %v1644_v48 }
0x11e5   : > { %v1894_v49 = vpop.eup %1893 }
0x11e6   : > { %v1646_v50 = vmul.f32 %v1894_v49, %v1644_v48  ;;  %vm1652_vm0 = vweird.f32 %v1894_v49 }
0x11e7   : > { %vm1653_vm1 = vmor %vm1651_vm15, %vm1652_vm0 }
0x11e8   : > { %v1647_v51 = vmul.f32 %v1894_v49, %v1646_v50 }
0x11ea   : > { %v1648_v52 = vmul.f32 0.5, %v1647_v51 }
0x11ec   : > { %v1649_v53 = vsub.f32 1.5, %v1648_v52 }
0x11ee   : > { %v1650_v54 = vmul.f32 %v1894_v49, %v1649_v53 }
0x11f0   : > { %v1654_v56 = vsel %vm1653_vm1, %v1894_v49, %v1650_v54 }
0x11f1   : > { %v1655_v57 = vmul.f32 %v1654_v56, %v1638_v40 }
0x11f3   : > { %v1659_v59 = vmul.f32 %v1854_v55, %v1655_v57 }
0x11f5   : > { %v1663_v60 = vadd.f32 %v1855_v58, %v1659_v59 }
0x11f7   : > { %1815 = vmatmul.msk.f32.vlgmr.msrb.gmra.mxu0 %vm825_vm5, %v1663_v60 }
0x1274   : > { %v1690_v62 = vpop.f32.mrf.mxu0 }
0x1275   : > { %v1691_v63 = vadd.f32 %v1856_v61, %v1690_v62 }
0x1277   : > { %1693 = vst [vmem:[%s746_s1] sm:$0xff] %v1691_v63 }
0x1278 PF: > { %s34_s5 = sadd.s32 1, %s1901_s5  }
0x1279   : > { %p31_p4 = scmp.ge.s32.totalorder %s34_s5, 4  }
0x127b   :  { %33 = sbr.rel (!%p31_p4) target bundleno = 10 (0xa), region = 161 }

</bundles_post_ra>
